<compile_context>
chip_gen: v6e
topology: v6e:2x2x1
jax: 0.10.0
libtpu: 0.0.40
codegen_flags: <defaults>
</compile_context>

<pallas_src>
from functools import partial

import jax
import jax.numpy as jnp
from jax.experimental import pallas as pl
from jax.experimental.pallas import tpu as pltpu


def _cross_attn_kernel(x_ref, k_ref, v_ref, wq_ref, wk_ref, wv_ref,
                       wp_ref, bp_ref, o_ref, kh_ref, vh_ref,
                       *, num_heads, head_dim):
    in_dtype = x_ref.dtype
    nk = kh_ref.shape[1]

    # --- Per-batch K/V projection, hoisted out of the query-tile loop. -------
    # Only at the first query tile of each batch element; the result (already
    # in head-major (H, Nk, hd) layout) lives in VMEM scratch and is reused by
    # every subsequent N-tile of the same batch element ("arbitrary" N axis).
    @pl.when(pl.program_id(1) == 0)
    def _():
        kk = jnp.dot(k_ref[0], wk_ref[...],
                     preferred_element_type=jnp.float32)            # (Nk, H*hd)
        vv = jnp.dot(v_ref[0], wv_ref[...],
                     preferred_element_type=jnp.float32)            # (Nv, H*hd)
        kh_ref[...] = jnp.transpose(
            kk.reshape(nk, num_heads, head_dim), (1, 0, 2)).astype(kh_ref.dtype)
        vh_ref[...] = jnp.transpose(
            vv.reshape(nk, num_heads, head_dim), (1, 0, 2)).astype(vh_ref.dtype)

    # --- Query projection for the current (b, i) tile. -----------------------
    # The softmax scale is already folded into Wq by the wrapper.
    x = x_ref[0]                                                    # (TN, C)
    q = jnp.dot(x, wq_ref[...],
                preferred_element_type=jnp.float32).astype(in_dtype)
    tn = q.shape[0]
    qh = jnp.transpose(q.reshape(tn, num_heads, head_dim), (1, 0, 2))  # (H,TN,hd)

    # --- Scaled dot-product attention (softmax math in f32). -----------------
    s = jnp.einsum("hqd,hkd->hqk", qh, kh_ref[...],
                   preferred_element_type=jnp.float32)              # (H, TN, Nk)
    s = s - jnp.max(s, axis=-1, keepdims=True)
    p = jnp.exp(s)
    inv = pl.reciprocal(jnp.sum(p, axis=-1, keepdims=True), approx=True)  # (H,TN,1)
    # attn_drop / proj_drop are identity (p = 0.0 module defaults / eval mode).

    ctx = jnp.einsum("hqk,hkd->hqd", p.astype(in_dtype), vh_ref[...],
                     preferred_element_type=jnp.float32)            # (H, TN, hd)
    # Deferred softmax normalization: multiply into the (H,TN,hd) context,
    # not the (H,TN,Nk) probabilities.
    ctx = ctx * inv

    # --- Output projection (+ bias). pad_out is lane-dense (multiple of 128).
    ctx2 = jnp.transpose(ctx, (1, 0, 2)).reshape(tn, num_heads * head_dim)
    out = jnp.dot(ctx2.astype(in_dtype), wp_ref[...],
                  preferred_element_type=jnp.float32) + bp_ref[...]
    o_ref[0] = out.astype(o_ref.dtype)

    # TODO(synk): for very long Nk (v7x, 64 MiB VMEM) convert the softmax/PV
    # section to a flash-style online softmax over Nk tiles (m/l/acc scratch,
    # K/V pre-projected by a separate tiled matmul) so the (H,TN,Nk) scores and
    # the full projected K/V never materialize in VMEM.
    # TODO(synk): for very large C, tile the projection contraction over C with
    # an f32 accumulator (or keep weights in HBM via memory_space=pl.ANY +
    # emit_pipeline) so weight VMEM is independent of C.


def _vmem_limit_bytes():
    # Generation-aware budget: ~80% of physical per-core VMEM, capped at 100 MiB
    # (v5e/v6e: 128 MiB physical; v7x: 64 MiB -> ~51 MiB with headroom).
    try:
        cap = pltpu.get_tpu_info().vmem_capacity_bytes
        return min(int(cap * 0.8), 100 * 1024 * 1024)
    except Exception:
        return 48 * 1024 * 1024  # safe on every generation


def _default_block_n():
    # v6e/v7x MXU is 2x256^2: a 256-row query tile fills the M dimension.
    # v5e's 4x128^2 MXU is already saturated by 128-row tiles.
    try:
        kind = jax.devices()[0].device_kind.lower()
    except Exception:
        return 128
    return 256 if ("v6" in kind or "v7" in kind) else 128


def cross_attention(x, k, v, wq, wk, wv, wp, bp, *, num_heads,
                    qk_scale=None, block_n=None, compute_dtype=None):
    """Pallas forward of InternVL CrossAttention (qkv_bias=False, dropout=0).

    x: (B, N, C), k/v: (B, Nk, C); weights stored (in_dim, out_dim).  Pass
    compute_dtype=jnp.bfloat16 for peak MXU rate (activations and weights are
    cast in the wrapper; softmax math and accumulation stay f32).
    """
    B, N, C = x.shape
    Nk = k.shape[1]
    assert v.shape[1] == Nk, "CrossAttention requires N_k == N_v"
    assert C % num_heads == 0
    head_dim = C // num_heads
    scale = head_dim ** (-0.5) if qk_scale is None else qk_scale
    out_dim = wp.shape[1]

    # Fold the softmax scale into Wq once (ideally at parameter-prep time; here
    # a one-off wrapper op instead of a per-grid-step VPU multiply).
    wq = wq * jnp.asarray(scale, wq.dtype)

    if compute_dtype is not None:
        x, k, v = (t.astype(compute_dtype) for t in (x, k, v))
        wq, wk, wv, wp = (t.astype(compute_dtype) for t in (wq, wk, wv, wp))
    bp = bp.astype(jnp.float32)  # bias is added to the f32 accumulator

    # Lane-dense output: pad the projection width up to a multiple of 128
    # (padded columns are zero); sliced back below.
    pad_out = ((out_dim + 127) // 128) * 128
    if pad_out != out_dim:
        wp = jnp.pad(wp, ((0, 0), (0, pad_out - out_dim)))
        bp = jnp.pad(bp, (0, pad_out - out_dim))
    bp2 = bp.reshape(1, pad_out)

    if block_n is None:
        block_n = _default_block_n()
    tn = N if N <= block_n else block_n
    grid = (B, pl.cdiv(N, tn))

    kernel = partial(_cross_attn_kernel, num_heads=num_heads, head_dim=head_dim)
    scratch_dtype = x.dtype

    def build_and_run(single_buffer_weights):
        def wspec(shape):
            # Grid-constant weights/bias: never re-DMA'd; single-buffer them so
            # the second pipeline buffer doesn't waste VMEM.
            if single_buffer_weights:
                return pl.BlockSpec(shape, lambda b, i: (0, 0),
                                    pipeline_mode=pl.Buffered(1))
            return pl.BlockSpec(shape, lambda b, i: (0, 0))

        return pl.pallas_call(
            kernel,
            out_shape=jax.ShapeDtypeStruct((B, N, pad_out), x.dtype),
            grid=grid,
            in_specs=[
                pl.BlockSpec((1, tn, C), lambda b, i: (b, i, 0)),   # x  (N tiled)
                pl.BlockSpec((1, Nk, C), lambda b, i: (b, 0, 0)),   # k  (per batch)
                pl.BlockSpec((1, Nk, C), lambda b, i: (b, 0, 0)),   # v  (per batch)
                wspec((C, C)),                                      # Wq (scaled)
                wspec((C, C)),                                      # Wk
                wspec((C, C)),                                      # Wv
                wspec((C, pad_out)),                                # Wproj (padded)
                wspec((1, pad_out)),                                # bias  (padded)
            ],
            out_specs=pl.BlockSpec((1, tn, pad_out), lambda b, i: (b, i, 0)),
            scratch_shapes=[
                pltpu.VMEM((num_heads, Nk, head_dim), scratch_dtype),  # K heads
                pltpu.VMEM((num_heads, Nk, head_dim), scratch_dtype),  # V heads
            ],
            compiler_params=pltpu.CompilerParams(
                # B sharded across TensorCores; N must be "arbitrary" so the
                # per-batch K/V scratch is carried across query tiles.
                dimension_semantics=("parallel", "arbitrary"),
                vmem_limit_bytes=_vmem_limit_bytes(),
            ),
        )(x, k, v, wq, wk, wv, wp, bp2)

    try:
        out = build_and_run(True)
    except Exception:
        # jax versions without BlockSpec.pipeline_mode / Buffered(1) support.
        out = build_and_run(False)

    if pad_out != out_dim:
        out = out[..., :out_dim]
    return out


def cross_attention_ref(x, k, v, wq, wk, wv, wp, bp, *, num_heads):
    """Plain-JAX reference mirroring the PyTorch forward exactly."""
    B, N, C = x.shape
    head_dim = C // num_heads
    scale = head_dim ** (-0.5)

    q = x @ wq
    kk = k @ wk
    vv = v @ wv

    def split(t):
        Bx, Nx, _ = t.shape
        return t.reshape(Bx, Nx, num_heads, head_dim).transpose(0, 2, 1, 3)

    qh, kh, vh = split(q) * scale, split(kk), split(vv)
    attn = jnp.einsum("bhqd,bhkd->bhqk", qh, kh)
    attn = jax.nn.softmax(attn, axis=-1)
    ctx = jnp.einsum("bhqk,bhkd->bhqd", attn, vh)
    ctx = ctx.transpose(0, 2, 1, 3).reshape(B, N, -1)
    return ctx @ wp + bp


if __name__ == "__main__":
    # Small shapes consistent with the module: dim=32, heads=4 -> head_dim=8.
    B, N, Nk, C, H = 2, 8, 8, 32, 4
    out_dim = C

    key = jax.random.PRNGKey(0)
    kx, kk_, kv, k1, k2, k3, k4, k5 = jax.random.split(key, 8)

    x = jax.random.normal(kx, (B, N, C), dtype=jnp.float32)
    k = jax.random.normal(kk_, (B, Nk, C), dtype=jnp.float32)
    v = jax.random.normal(kv, (B, Nk, C), dtype=jnp.float32)

    # Deterministic parameters (weights stored as (in, out)).
    wq = 0.05 * jax.random.normal(k1, (C, C), dtype=jnp.float32)
    wk = 0.05 * jax.random.normal(k2, (C, C), dtype=jnp.float32)
    wv = 0.05 * jax.random.normal(k3, (C, C), dtype=jnp.float32)
    wp = 0.05 * jax.random.normal(k4, (C, out_dim), dtype=jnp.float32)
    bp = 0.05 * jax.random.normal(k5, (out_dim,), dtype=jnp.float32)

    out = cross_attention(x, k, v, wq, wk, wv, wp, bp, num_heads=H)
    out = jax.block_until_ready(out)

    ref = cross_attention_ref(x, k, v, wq, wk, wv, wp, bp, num_heads=H)
    assert out.shape == (B, N, out_dim)
    # Tolerance covers the EUP approximate reciprocal in the softmax denominator.
    err = float(jnp.max(jnp.abs(out - ref)))
    assert jnp.allclose(out, ref, atol=5e-3, rtol=5e-3), err

    print("KERNEL_OK")
</pallas_src>

<mosaic_0001>
module attributes {stable_mosaic.version = 11 : i64} {
  func.func @_cross_attn_kernel(%arg0: i32, %arg1: i32, %arg2: memref<1x8x32xf32, #tpu.memory_space<vmem>>, %arg3: memref<1x8x32xf32, #tpu.memory_space<vmem>>, %arg4: memref<1x8x32xf32, #tpu.memory_space<vmem>>, %arg5: memref<32x32xf32, #tpu.memory_space<vmem>>, %arg6: memref<32x32xf32, #tpu.memory_space<vmem>>, %arg7: memref<32x32xf32, #tpu.memory_space<vmem>>, %arg8: memref<32x128xf32, #tpu.memory_space<vmem>>, %arg9: memref<1x128xf32, #tpu.memory_space<vmem>>, %arg10: memref<1x8x128xf32, #tpu.memory_space<vmem>>, %arg11: memref<4x8x8xf32, #tpu.memory_space<vmem>>, %arg12: memref<4x8x8xf32, #tpu.memory_space<vmem>>) attributes {dimension_semantics = [#tpu.dimension_semantics<parallel>, #tpu.dimension_semantics<arbitrary>], iteration_bounds = array<i64: 2, 1>, scalar_prefetch = 0 : i64, scratch_operands = 2 : i64, tpu.core_type = #tpu.core_type<tc>, window_params = [{transform_indices = @transform_0, window_bounds = array<i64: 1, 8, 32>}, {transform_indices = @transform_1, window_bounds = array<i64: 1, 8, 32>}, {transform_indices = @transform_2, window_bounds = array<i64: 1, 8, 32>}, {pipeline_mode = #tpu.pipeline_mode<synchronous>, transform_indices = @transform_3, window_bounds = array<i64: 32, 32>}, {pipeline_mode = #tpu.pipeline_mode<synchronous>, transform_indices = @transform_4, window_bounds = array<i64: 32, 32>}, {pipeline_mode = #tpu.pipeline_mode<synchronous>, transform_indices = @transform_5, window_bounds = array<i64: 32, 32>}, {pipeline_mode = #tpu.pipeline_mode<synchronous>, transform_indices = @transform_6, window_bounds = array<i64: 32, 128>}, {pipeline_mode = #tpu.pipeline_mode<synchronous>, transform_indices = @transform_7, window_bounds = array<i64: 1, 128>}, {transform_indices = @transform_8, window_bounds = array<i64: 1, 8, 128>}]} {
    %c0_i32 = arith.constant 0 : i32
    %0 = arith.cmpi eq, %arg1, %c0_i32 : i32
    %1 = arith.extui %0 : i1 to i32
    %c0_i32_0 = arith.constant 0 : i32
    %2 = arith.cmpi ne, %1, %c0_i32_0 : i32
    scf.if %2 {
      %c0_23 = arith.constant 0 : index
      %c0_24 = arith.constant 0 : index
      %c0_25 = arith.constant 0 : index
      %33 = vector.load %arg3[%c0_23, %c0_24, %c0_25] : memref<1x8x32xf32, #tpu.memory_space<vmem>>, vector<1x8x32xf32>
      %34 = vector.shape_cast %33 : vector<1x8x32xf32> to vector<8x32xf32>
      %c0_26 = arith.constant 0 : index
      %c0_27 = arith.constant 0 : index
      %35 = vector.load %arg6[%c0_26, %c0_27] : memref<32x32xf32, #tpu.memory_space<vmem>>, vector<32x32xf32>
      %cst_28 = arith.constant dense<0.000000e+00> : vector<8x32xf32>
      %36 = tpu.matmul %34, %35, %cst_28 {dimension_numbers = #tpu.dot_dimension_numbers<[1], [0], [0], [1], [0, 0, 1, 1], [], []>} : vector<8x32xf32>, vector<32x32xf32>, vector<8x32xf32> -> vector<8x32xf32>
      %c0_29 = arith.constant 0 : index
      %c0_30 = arith.constant 0 : index
      %c0_31 = arith.constant 0 : index
      %37 = vector.load %arg4[%c0_29, %c0_30, %c0_31] : memref<1x8x32xf32, #tpu.memory_space<vmem>>, vector<1x8x32xf32>
      %38 = vector.shape_cast %37 : vector<1x8x32xf32> to vector<8x32xf32>
      %c0_32 = arith.constant 0 : index
      %c0_33 = arith.constant 0 : index
      %39 = vector.load %arg7[%c0_32, %c0_33] : memref<32x32xf32, #tpu.memory_space<vmem>>, vector<32x32xf32>
      %cst_34 = arith.constant dense<0.000000e+00> : vector<8x32xf32>
      %40 = tpu.matmul %38, %39, %cst_34 {dimension_numbers = #tpu.dot_dimension_numbers<[1], [0], [0], [1], [0, 0, 1, 1], [], []>} : vector<8x32xf32>, vector<32x32xf32>, vector<8x32xf32> -> vector<8x32xf32>
      %41 = vector.shape_cast %36 : vector<8x32xf32> to vector<8x4x8xf32>
      %42 = tpu.transpose %41, [1, 0, 2] : vector<8x4x8xf32> -> vector<4x8x8xf32>
      %c0_35 = arith.constant 0 : index
      %c0_36 = arith.constant 0 : index
      %c0_37 = arith.constant 0 : index
      %43 = vector.load %arg11[%c0_35, %c0_36, %c0_37] : memref<4x8x8xf32, #tpu.memory_space<vmem>>, vector<4x8x8xf32>
      tpu.vector_store %arg11[%c0_35, %c0_36, %c0_37], %42 {strides = array<i32>} : memref<4x8x8xf32, #tpu.memory_space<vmem>>, vector<4x8x8xf32>,
      %44 = vector.shape_cast %40 : vector<8x32xf32> to vector<8x4x8xf32>
      %45 = tpu.transpose %44, [1, 0, 2] : vector<8x4x8xf32> -> vector<4x8x8xf32>
      %c0_38 = arith.constant 0 : index
      %c0_39 = arith.constant 0 : index
      %c0_40 = arith.constant 0 : index
      %46 = vector.load %arg12[%c0_38, %c0_39, %c0_40] : memref<4x8x8xf32, #tpu.memory_space<vmem>>, vector<4x8x8xf32>
      tpu.vector_store %arg12[%c0_38, %c0_39, %c0_40], %45 {strides = array<i32>} : memref<4x8x8xf32, #tpu.memory_space<vmem>>, vector<4x8x8xf32>,
    } else {
    }
    %c0 = arith.constant 0 : index
    %c0_1 = arith.constant 0 : index
    %c0_2 = arith.constant 0 : index
    %3 = vector.load %arg2[%c0, %c0_1, %c0_2] : memref<1x8x32xf32, #tpu.memory_space<vmem>>, vector<1x8x32xf32>
    %4 = vector.shape_cast %3 : vector<1x8x32xf32> to vector<8x32xf32>
    %c0_3 = arith.constant 0 : index
    %c0_4 = arith.constant 0 : index
    %5 = vector.load %arg5[%c0_3, %c0_4] : memref<32x32xf32, #tpu.memory_space<vmem>>, vector<32x32xf32>
    %cst = arith.constant dense<0.000000e+00> : vector<8x32xf32>
    %6 = tpu.matmul %4, %5, %cst {dimension_numbers = #tpu.dot_dimension_numbers<[1], [0], [0], [1], [0, 0, 1, 1], [], []>} : vector<8x32xf32>, vector<32x32xf32>, vector<8x32xf32> -> vector<8x32xf32>
    %7 = vector.shape_cast %6 : vector<8x32xf32> to vector<8x4x8xf32>
    %8 = tpu.transpose %7, [1, 0, 2] : vector<8x4x8xf32> -> vector<4x8x8xf32>
    %c0_5 = arith.constant 0 : index
    %c0_6 = arith.constant 0 : index
    %c0_7 = arith.constant 0 : index
    %9 = vector.load %arg11[%c0_5, %c0_6, %c0_7] : memref<4x8x8xf32, #tpu.memory_space<vmem>>, vector<4x8x8xf32>
    "tpu.trace_start"() <{level = 10 : i32, message = "hqd,hkd->hqk"}> : () -> ()
    %cst_8 = arith.constant dense<0.000000e+00> : vector<4x8x8xf32>
    %10 = tpu.matmul %8, %9, %cst_8 {dimension_numbers = #tpu.dot_dimension_numbers<[2], [2], [1], [1], [0, 0, 0, 1, 1, 1], [0], [0]>} : vector<4x8x8xf32>, vector<4x8x8xf32>, vector<4x8x8xf32> -> vector<4x8x8xf32>
    "tpu.trace_stop"() : () -> ()
    %cst_9 = arith.constant dense<0xFF800000> : vector<4x8xf32>
    %11 = vector.multi_reduction <maximumf>, %10, %cst_9 [2] : vector<4x8x8xf32> to vector<4x8xf32>
    %12 = vector.shape_cast %11 : vector<4x8xf32> to vector<4x8x1xf32>
    %13 = vector.broadcast %12 : vector<4x8x1xf32> to vector<4x8x8xf32>
    %14 = arith.subf %10, %13 : vector<4x8x8xf32>
    %15 = math.exp %14 : vector<4x8x8xf32>
    %cst_10 = arith.constant dense<0.000000e+00> : vector<4x8xf32>
    %16 = vector.multi_reduction <add>, %15, %cst_10 [2] : vector<4x8x8xf32> to vector<4x8xf32>
    %17 = vector.shape_cast %16 : vector<4x8xf32> to vector<4x8x1xf32>
    %18 = tpu.reciprocal %17 {approx = true} : vector<4x8x1xf32> -> vector<4x8x1xf32>
    %c0_11 = arith.constant 0 : index
    %c0_12 = arith.constant 0 : index
    %c0_13 = arith.constant 0 : index
    %19 = vector.load %arg12[%c0_11, %c0_12, %c0_13] : memref<4x8x8xf32, #tpu.memory_space<vmem>>, vector<4x8x8xf32>
    "tpu.trace_start"() <{level = 10 : i32, message = "hqk,hkd->hqd"}> : () -> ()
    %cst_14 = arith.constant dense<0.000000e+00> : vector<4x8x8xf32>
    %20 = tpu.matmul %15, %19, %cst_14 {dimension_numbers = #tpu.dot_dimension_numbers<[2], [1], [1], [2], [0, 0, 0, 1, 1, 2], [0], [0]>} : vector<4x8x8xf32>, vector<4x8x8xf32>, vector<4x8x8xf32> -> vector<4x8x8xf32>
    "tpu.trace_stop"() : () -> ()
    %21 = vector.broadcast %18 : vector<4x8x1xf32> to vector<4x8x8xf32>
    %22 = arith.mulf %20, %21 : vector<4x8x8xf32>
    %23 = tpu.transpose %22, [1, 0, 2] : vector<4x8x8xf32> -> vector<8x4x8xf32>
    %24 = vector.shape_cast %23 : vector<8x4x8xf32> to vector<8x32xf32>
    %c0_15 = arith.constant 0 : index
    %c0_16 = arith.constant 0 : index
    %25 = vector.load %arg8[%c0_15, %c0_16] : memref<32x128xf32, #tpu.memory_space<vmem>>, vector<32x128xf32>
    %cst_17 = arith.constant dense<0.000000e+00> : vector<8x128xf32>
    %26 = tpu.matmul %24, %25, %cst_17 {dimension_numbers = #tpu.dot_dimension_numbers<[1], [0], [0], [1], [0, 0, 1, 1], [], []>} : vector<8x32xf32>, vector<32x128xf32>, vector<8x128xf32> -> vector<8x128xf32>
    %c0_18 = arith.constant 0 : index
    %c0_19 = arith.constant 0 : index
    %27 = vector.load %arg9[%c0_18, %c0_19] : memref<1x128xf32, #tpu.memory_space<vmem>>, vector<1x128xf32>
    %28 = vector.broadcast %27 : vector<1x128xf32> to vector<8x128xf32>
    %29 = arith.addf %26, %28 : vector<8x128xf32>
    %c0_20 = arith.constant 0 : index
    %c0_21 = arith.constant 0 : index
    %c0_22 = arith.constant 0 : index
    %30 = vector.load %arg10[%c0_20, %c0_21, %c0_22] : memref<1x8x128xf32, #tpu.memory_space<vmem>>, vector<1x8x128xf32>
    %31 = vector.shape_cast %30 : vector<1x8x128xf32> to vector<8x128xf32>
    %32 = vector.shape_cast %29 : vector<8x128xf32> to vector<1x8x128xf32>
    tpu.vector_store %arg10[%c0_20, %c0_21, %c0_22], %32 {strides = array<i32>} : memref<1x8x128xf32, #tpu.memory_space<vmem>>, vector<1x8x128xf32>,
    return
  }
  func.func @transform_0(%arg0: i32, %arg1: i32) -> (i32, i32, i32) {
    %c0_i32 = arith.constant 0 : i32
    %c0_i32_0 = arith.constant 0 : i32
    return %arg0, %arg1, %c0_i32 : i32, i32, i32
  }
  func.func @transform_1(%arg0: i32, %arg1: i32) -> (i32, i32, i32) {
    %c0_i32 = arith.constant 0 : i32
    %c0_i32_0 = arith.constant 0 : i32
    %c0_i32_1 = arith.constant 0 : i32
    return %arg0, %c0_i32, %c0_i32_0 : i32, i32, i32
  }
  func.func @transform_2(%arg0: i32, %arg1: i32) -> (i32, i32, i32) {
    %c0_i32 = arith.constant 0 : i32
    %c0_i32_0 = arith.constant 0 : i32
    %c0_i32_1 = arith.constant 0 : i32
    return %arg0, %c0_i32, %c0_i32_0 : i32, i32, i32
  }
  func.func @transform_3(%arg0: i32, %arg1: i32) -> (i32, i32) {
    %c0_i32 = arith.constant 0 : i32
    %c0_i32_0 = arith.constant 0 : i32
    %c0_i32_1 = arith.constant 0 : i32
    return %c0_i32, %c0_i32_0 : i32, i32
  }
  func.func @transform_4(%arg0: i32, %arg1: i32) -> (i32, i32) {
    %c0_i32 = arith.constant 0 : i32
    %c0_i32_0 = arith.constant 0 : i32
    %c0_i32_1 = arith.constant 0 : i32
    return %c0_i32, %c0_i32_0 : i32, i32
  }
  func.func @transform_5(%arg0: i32, %arg1: i32) -> (i32, i32) {
    %c0_i32 = arith.constant 0 : i32
    %c0_i32_0 = arith.constant 0 : i32
    %c0_i32_1 = arith.constant 0 : i32
    return %c0_i32, %c0_i32_0 : i32, i32
  }
  func.func @transform_6(%arg0: i32, %arg1: i32) -> (i32, i32) {
    %c0_i32 = arith.constant 0 : i32
    %c0_i32_0 = arith.constant 0 : i32
    %c0_i32_1 = arith.constant 0 : i32
    return %c0_i32, %c0_i32_0 : i32, i32
  }
  func.func @transform_7(%arg0: i32, %arg1: i32) -> (i32, i32) {
    %c0_i32 = arith.constant 0 : i32
    %c0_i32_0 = arith.constant 0 : i32
    %c0_i32_1 = arith.constant 0 : i32
    return %c0_i32, %c0_i32_0 : i32, i32
  }
  func.func @transform_8(%arg0: i32, %arg1: i32) -> (i32, i32, i32) {
    %c0_i32 = arith.constant 0 : i32
    %c0_i32_0 = arith.constant 0 : i32
    return %arg0, %arg1, %c0_i32 : i32, i32, i32
  }
}

module attributes {stable_mosaic.version = 11 : i64} {
  func.func @_cross_attn_kernel(%arg0: i32, %arg1: i32, %arg2: memref<1x8x32xf32, #tpu.memory_space<vmem>>, %arg3: memref<1x8x32xf32, #tpu.memory_space<vmem>>, %arg4: memref<1x8x32xf32, #tpu.memory_space<vmem>>, %arg5: memref<32x32xf32, #tpu.memory_space<vmem>>, %arg6: memref<32x32xf32, #tpu.memory_space<vmem>>, %arg7: memref<32x32xf32, #tpu.memory_space<vmem>>, %arg8: memref<32x128xf32, #tpu.memory_space<vmem>>, %arg9: memref<1x128xf32, #tpu.memory_space<vmem>>, %arg10: memref<1x8x128xf32, #tpu.memory_space<vmem>>, %arg11: memref<4x8x8xf32, #tpu.memory_space<vmem>>, %arg12: memref<4x8x8xf32, #tpu.memory_space<vmem>>) attributes {dimension_semantics = [#tpu.dimension_semantics<parallel>, #tpu.dimension_semantics<arbitrary>], iteration_bounds = array<i64: 2, 1>, scalar_prefetch = 0 : i64, scratch_operands = 2 : i64, tpu.core_type = #tpu.core_type<tc>, window_params = [{transform_indices = @transform_0, window_bounds = array<i64: 1, 8, 32>}, {transform_indices = @transform_1, window_bounds = array<i64: 1, 8, 32>}, {transform_indices = @transform_2, window_bounds = array<i64: 1, 8, 32>}, {pipeline_mode = #tpu.pipeline_mode<synchronous>, transform_indices = @transform_3, window_bounds = array<i64: 32, 32>}, {pipeline_mode = #tpu.pipeline_mode<synchronous>, transform_indices = @transform_4, window_bounds = array<i64: 32, 32>}, {pipeline_mode = #tpu.pipeline_mode<synchronous>, transform_indices = @transform_5, window_bounds = array<i64: 32, 32>}, {pipeline_mode = #tpu.pipeline_mode<synchronous>, transform_indices = @transform_6, window_bounds = array<i64: 32, 128>}, {pipeline_mode = #tpu.pipeline_mode<synchronous>, transform_indices = @transform_7, window_bounds = array<i64: 1, 128>}, {transform_indices = @transform_8, window_bounds = array<i64: 1, 8, 128>}]} {
    %c0_i32 = arith.constant 0 : i32
    %0 = arith.cmpi eq, %arg1, %c0_i32 : i32
    %1 = arith.extui %0 : i1 to i32
    %c0_i32_0 = arith.constant 0 : i32
    %2 = arith.cmpi ne, %1, %c0_i32_0 : i32
    scf.if %2 {
      %c0_23 = arith.constant 0 : index
      %c0_24 = arith.constant 0 : index
      %c0_25 = arith.constant 0 : index
      %33 = vector.load %arg3[%c0_23, %c0_24, %c0_25] : memref<1x8x32xf32, #tpu.memory_space<vmem>>, vector<1x8x32xf32>
      %34 = vector.shape_cast %33 : vector<1x8x32xf32> to vector<8x32xf32>
      %c0_26 = arith.constant 0 : index
      %c0_27 = arith.constant 0 : index
      %35 = vector.load %arg6[%c0_26, %c0_27] : memref<32x32xf32, #tpu.memory_space<vmem>>, vector<32x32xf32>
      %cst_28 = arith.constant dense<0.000000e+00> : vector<8x32xf32>
      %36 = tpu.matmul %34, %35, %cst_28 {dimension_numbers = #tpu.dot_dimension_numbers<[1], [0], [0], [1], [0, 0, 1, 1], [], []>} : vector<8x32xf32>, vector<32x32xf32>, vector<8x32xf32> -> vector<8x32xf32>
      %c0_29 = arith.constant 0 : index
      %c0_30 = arith.constant 0 : index
      %c0_31 = arith.constant 0 : index
      %37 = vector.load %arg4[%c0_29, %c0_30, %c0_31] : memref<1x8x32xf32, #tpu.memory_space<vmem>>, vector<1x8x32xf32>
      %38 = vector.shape_cast %37 : vector<1x8x32xf32> to vector<8x32xf32>
      %c0_32 = arith.constant 0 : index
      %c0_33 = arith.constant 0 : index
      %39 = vector.load %arg7[%c0_32, %c0_33] : memref<32x32xf32, #tpu.memory_space<vmem>>, vector<32x32xf32>
      %cst_34 = arith.constant dense<0.000000e+00> : vector<8x32xf32>
      %40 = tpu.matmul %38, %39, %cst_34 {dimension_numbers = #tpu.dot_dimension_numbers<[1], [0], [0], [1], [0, 0, 1, 1], [], []>} : vector<8x32xf32>, vector<32x32xf32>, vector<8x32xf32> -> vector<8x32xf32>
      %41 = vector.shape_cast %36 : vector<8x32xf32> to vector<8x4x8xf32>
      %42 = tpu.transpose %41, [1, 0, 2] : vector<8x4x8xf32> -> vector<4x8x8xf32>
      %c0_35 = arith.constant 0 : index
      %c0_36 = arith.constant 0 : index
      %c0_37 = arith.constant 0 : index
      %43 = vector.load %arg11[%c0_35, %c0_36, %c0_37] : memref<4x8x8xf32, #tpu.memory_space<vmem>>, vector<4x8x8xf32>
      tpu.vector_store %arg11[%c0_35, %c0_36, %c0_37], %42 {strides = array<i32>} : memref<4x8x8xf32, #tpu.memory_space<vmem>>, vector<4x8x8xf32>,
      %44 = vector.shape_cast %40 : vector<8x32xf32> to vector<8x4x8xf32>
      %45 = tpu.transpose %44, [1, 0, 2] : vector<8x4x8xf32> -> vector<4x8x8xf32>
      %c0_38 = arith.constant 0 : index
      %c0_39 = arith.constant 0 : index
      %c0_40 = arith.constant 0 : index
      %46 = vector.load %arg12[%c0_38, %c0_39, %c0_40] : memref<4x8x8xf32, #tpu.memory_space<vmem>>, vector<4x8x8xf32>
      tpu.vector_store %arg12[%c0_38, %c0_39, %c0_40], %45 {strides = array<i32>} : memref<4x8x8xf32, #tpu.memory_space<vmem>>, vector<4x8x8xf32>,
    } else {
    }
    %c0 = arith.constant 0 : index
    %c0_1 = arith.constant 0 : index
    %c0_2 = arith.constant 0 : index
    %3 = vector.load %arg2[%c0, %c0_1, %c0_2] : memref<1x8x32xf32, #tpu.memory_space<vmem>>, vector<1x8x32xf32>
    %4 = vector.shape_cast %3 : vector<1x8x32xf32> to vector<8x32xf32>
    %c0_3 = arith.constant 0 : index
    %c0_4 = arith.constant 0 : index
    %5 = vector.load %arg5[%c0_3, %c0_4] : memref<32x32xf32, #tpu.memory_space<vmem>>, vector<32x32xf32>
    %cst = arith.constant dense<0.000000e+00> : vector<8x32xf32>
    %6 = tpu.matmul %4, %5, %cst {dimension_numbers = #tpu.dot_dimension_numbers<[1], [0], [0], [1], [0, 0, 1, 1], [], []>} : vector<8x32xf32>, vector<32x32xf32>, vector<8x32xf32> -> vector<8x32xf32>
    %7 = vector.shape_cast %6 : vector<8x32xf32> to vector<8x4x8xf32>
    %8 = tpu.transpose %7, [1, 0, 2] : vector<8x4x8xf32> -> vector<4x8x8xf32>
    %c0_5 = arith.constant 0 : index
    %c0_6 = arith.constant 0 : index
    %c0_7 = arith.constant 0 : index
    %9 = vector.load %arg11[%c0_5, %c0_6, %c0_7] : memref<4x8x8xf32, #tpu.memory_space<vmem>>, vector<4x8x8xf32>
    "tpu.trace_start"() <{level = 10 : i32, message = "hqd,hkd->hqk"}> : () -> ()
    %cst_8 = arith.constant dense<0.000000e+00> : vector<4x8x8xf32>
    %10 = tpu.matmul %8, %9, %cst_8 {dimension_numbers = #tpu.dot_dimension_numbers<[2], [2], [1], [1], [0, 0, 0, 1, 1, 1], [0], [0]>} : vector<4x8x8xf32>, vector<4x8x8xf32>, vector<4x8x8xf32> -> vector<4x8x8xf32>
    "tpu.trace_stop"() : () -> ()
    %cst_9 = arith.constant dense<0xFF800000> : vector<4x8xf32>
    %11 = vector.multi_reduction <maximumf>, %10, %cst_9 [2] : vector<4x8x8xf32> to vector<4x8xf32>
    %12 = vector.shape_cast %11 : vector<4x8xf32> to vector<4x8x1xf32>
    %13 = vector.broadcast %12 : vector<4x8x1xf32> to vector<4x8x8xf32>
    %14 = arith.subf %10, %13 : vector<4x8x8xf32>
    %15 = math.exp %14 : vector<4x8x8xf32>
    %cst_10 = arith.constant dense<0.000000e+00> : vector<4x8xf32>
    %16 = vector.multi_reduction <add>, %15, %cst_10 [2] : vector<4x8x8xf32> to vector<4x8xf32>
    %17 = vector.shape_cast %16 : vector<4x8xf32> to vector<4x8x1xf32>
    %18 = tpu.reciprocal %17 {approx = true} : vector<4x8x1xf32> -> vector<4x8x1xf32>
    %c0_11 = arith.constant 0 : index
    %c0_12 = arith.constant 0 : index
    %c0_13 = arith.constant 0 : index
    %19 = vector.load %arg12[%c0_11, %c0_12, %c0_13] : memref<4x8x8xf32, #tpu.memory_space<vmem>>, vector<4x8x8xf32>
    "tpu.trace_start"() <{level = 10 : i32, message = "hqk,hkd->hqd"}> : () -> ()
    %cst_14 = arith.constant dense<0.000000e+00> : vector<4x8x8xf32>
    %20 = tpu.matmul %15, %19, %cst_14 {dimension_numbers = #tpu.dot_dimension_numbers<[2], [1], [1], [2], [0, 0, 0, 1, 1, 2], [0], [0]>} : vector<4x8x8xf32>, vector<4x8x8xf32>, vector<4x8x8xf32> -> vector<4x8x8xf32>
    "tpu.trace_stop"() : () -> ()
    %21 = vector.broadcast %18 : vector<4x8x1xf32> to vector<4x8x8xf32>
    %22 = arith.mulf %20, %21 : vector<4x8x8xf32>
    %23 = tpu.transpose %22, [1, 0, 2] : vector<4x8x8xf32> -> vector<8x4x8xf32>
    %24 = vector.shape_cast %23 : vector<8x4x8xf32> to vector<8x32xf32>
    %c0_15 = arith.constant 0 : index
    %c0_16 = arith.constant 0 : index
    %25 = vector.load %arg8[%c0_15, %c0_16] : memref<32x128xf32, #tpu.memory_space<vmem>>, vector<32x128xf32>
    %cst_17 = arith.constant dense<0.000000e+00> : vector<8x128xf32>
    %26 = tpu.matmul %24, %25, %cst_17 {dimension_numbers = #tpu.dot_dimension_numbers<[1], [0], [0], [1], [0, 0, 1, 1], [], []>} : vector<8x32xf32>, vector<32x128xf32>, vector<8x128xf32> -> vector<8x128xf32>
    %c0_18 = arith.constant 0 : index
    %c0_19 = arith.constant 0 : index
    %27 = vector.load %arg9[%c0_18, %c0_19] : memref<1x128xf32, #tpu.memory_space<vmem>>, vector<1x128xf32>
    %28 = vector.broadcast %27 : vector<1x128xf32> to vector<8x128xf32>
    %29 = arith.addf %26, %28 : vector<8x128xf32>
    %c0_20 = arith.constant 0 : index
    %c0_21 = arith.constant 0 : index
    %c0_22 = arith.constant 0 : index
    %30 = vector.load %arg10[%c0_20, %c0_21, %c0_22] : memref<1x8x128xf32, #tpu.memory_space<vmem>>, vector<1x8x128xf32>
    %31 = vector.shape_cast %30 : vector<1x8x128xf32> to vector<8x128xf32>
    %32 = vector.shape_cast %29 : vector<8x128xf32> to vector<1x8x128xf32>
    tpu.vector_store %arg10[%c0_20, %c0_21, %c0_22], %32 {strides = array<i32>} : memref<1x8x128xf32, #tpu.memory_space<vmem>>, vector<1x8x128xf32>,
    return
  }
  func.func @transform_0(%arg0: i32, %arg1: i32) -> (i32, i32, i32) {
    %c0_i32 = arith.constant 0 : i32
    %c0_i32_0 = arith.constant 0 : i32
    return %arg0, %arg1, %c0_i32 : i32, i32, i32
  }
  func.func @transform_1(%arg0: i32, %arg1: i32) -> (i32, i32, i32) {
    %c0_i32 = arith.constant 0 : i32
    %c0_i32_0 = arith.constant 0 : i32
    %c0_i32_1 = arith.constant 0 : i32
    return %arg0, %c0_i32, %c0_i32_0 : i32, i32, i32
  }
  func.func @transform_2(%arg0: i32, %arg1: i32) -> (i32, i32, i32) {
    %c0_i32 = arith.constant 0 : i32
    %c0_i32_0 = arith.constant 0 : i32
    %c0_i32_1 = arith.constant 0 : i32
    return %arg0, %c0_i32, %c0_i32_0 : i32, i32, i32
  }
  func.func @transform_3(%arg0: i32, %arg1: i32) -> (i32, i32) {
    %c0_i32 = arith.constant 0 : i32
    %c0_i32_0 = arith.constant 0 : i32
    %c0_i32_1 = arith.constant 0 : i32
    return %c0_i32, %c0_i32_0 : i32, i32
  }
  func.func @transform_4(%arg0: i32, %arg1: i32) -> (i32, i32) {
    %c0_i32 = arith.constant 0 : i32
    %c0_i32_0 = arith.constant 0 : i32
    %c0_i32_1 = arith.constant 0 : i32
    return %c0_i32, %c0_i32_0 : i32, i32
  }
  func.func @transform_5(%arg0: i32, %arg1: i32) -> (i32, i32) {
    %c0_i32 = arith.constant 0 : i32
    %c0_i32_0 = arith.constant 0 : i32
    %c0_i32_1 = arith.constant 0 : i32
    return %c0_i32, %c0_i32_0 : i32, i32
  }
  func.func @transform_6(%arg0: i32, %arg1: i32) -> (i32, i32) {
    %c0_i32 = arith.constant 0 : i32
    %c0_i32_0 = arith.constant 0 : i32
    %c0_i32_1 = arith.constant 0 : i32
    return %c0_i32, %c0_i32_0 : i32, i32
  }
  func.func @transform_7(%arg0: i32, %arg1: i32) -> (i32, i32) {
    %c0_i32 = arith.constant 0 : i32
    %c0_i32_0 = arith.constant 0 : i32
    %c0_i32_1 = arith.constant 0 : i32
    return %c0_i32, %c0_i32_0 : i32, i32
  }
  func.func @transform_8(%arg0: i32, %arg1: i32) -> (i32, i32, i32) {
    %c0_i32 = arith.constant 0 : i32
    %c0_i32_0 = arith.constant 0 : i32
    return %arg0, %arg1, %c0_i32 : i32, i32, i32
  }
}

</mosaic_0001>

<bundles_post_ra>
// kernel: tpu_custom_call.1
= control target key start
LH: loop header
LB: loop body
LE: loop exit
PB: predicated region body
PF: predicated region fallthrough
CT: control target
= control target key end

     0   :  { %s3304_s0 = inlined_call_operand.hbm [shape: f32[2,8,32], index: 0, kind: input, shape index: {}]   ;;  %s3305_s1 = inlined_call_operand.hbm [shape: f32[2,8,32], index: 1, kind: input, shape index: {}]   ;;  %s3306_s2 = inlined_call_operand.hbm [shape: f32[2,8,32], index: 2, kind: input, shape index: {}]   ;;  %s3307_s3 = inlined_call_operand.hbm [shape: f32[32,32], index: 3, kind: input, shape index: {}]   ;;  %s3308_s4 = inlined_call_operand.hbm [shape: f32[32,32], index: 4, kind: input, shape index: {}]   ;;  %s3309_s5 = inlined_call_operand.hbm [shape: f32[32,32], index: 5, kind: input, shape index: {}]   ;;  %s3310_s6 = inlined_call_operand.hbm [shape: f32[32,128], index: 6, kind: input, shape index: {}]   ;;  %s3311_s7 = inlined_call_operand.vmem [shape: f32[1,128], index: 7, kind: input, shape index: {}]   ;;  %s3312_s8 = inlined_call_operand.hbm [shape: f32[2,8,128], index: 8, kind: output, shape index: {}]  }
   0x1   :  { %3328 = sst [smem:[#allocation28_spill]] %s3305_s1 }
   0x2   :  { %3329 = sst [smem:[#allocation29_spill]] %s3307_s3 }
   0x3   :  { %3330 = sst [smem:[#allocation30_spill]] %s3308_s4 }
   0x4   :  { %3331 = sst [smem:[#allocation31_spill]] %s3309_s5 }
   0x5   :  { %13 = vsyncpa [#allocation5], 0 }
   0x6   :  { %15 = vsyncpa [#allocation5 + $0x1], 0 }
   0x7   :  { %16 = vsyncpa [#allocation8], 0 }
   0x8   :  { %18 = vsyncpa [#allocation8 + $0x1], 0 }
   0x9   :  { %19 = vsyncpa [#allocation11], 0 }
   0xa   :  { %20 = vsyncpa [#allocation14], 0 }
   0xb   :  { %21 = vsyncpa [#allocation6], 0 }
   0xc   :  { %23 = vsyncpa [#allocation6 + $0x1], 0  ;;  %s2877_s27 = smov 0   ;;  %s2879_s28 = smov 0  }
   0xd   :  { %s2881_s29 = smov 0   ;;  %s2883_s30 = smov 0  }
   0xe   :  { %s2885_s9 = smov 0   ;;  %s2887_s10 = smov 0  }
   0xf LB: > { %3332 = sst [smem:[#allocation22_spill]] %s2790_s27  ;;  %s2908_s11 = sadd.s32 4294967295, %s2810_s10   ;;  %s2810_s10 = sphi %s2887_s10, %s29_s10   ;;  %s2806_s9 = sphi %s2885_s9, %s3368_s9   ;;  %s2802_s30 = sphi %s2883_s30, %s3367_s30   ;;  %s2798_s29 = sphi %s2881_s29, %s3371_s29   ;;  %s2794_s28 = sphi %s2879_s28, %s3370_s28   ;;  %s2790_s27 = sphi %s2877_s27, %s3369_s27  }
  0x10   : > { %3333 = sst [smem:[#allocation23_spill]] %s2806_s9  ;;  %p2219_p0 = scmp.ge.s32.totalorder %s2810_s10, 1 }
  0x11   : > { %3334 = sst [smem:[#allocation24_spill]] %s2810_s10  ;;  %p3322_p1 = scmp.eq.s32.totalorder %s2908_s11, 0 }
  0x12   : > { %p259_p2 = scmp.lt.s32.totalorder %s2810_s10, 3  ;;  %s2812_s13 = smov [#allocation10]  }
  0x13   : > { %s271_s14 = sshll.u32 %s2812_s13, 4  ;;  %s2813_s16 = smov [#allocation13]   ;;  %s272_s14 = int_to_ptr.vmem [resolvable:$true] %s271_s14 }
  0x14   : > { %p2913_p3 = pnand %p2219_p0, %p259_p2  ;;  %s297_s17 = sshll.u32 %s2813_s16, 4  ;;  %s298_s17 = int_to_ptr.vmem [resolvable:$true] %s297_s17 }
  0x15   : > { %s2541_s18 = scalar_lea.vmem %s272_s14, 512  ;;  %p2549_p11 = scmp.lt.s32.totalorder %s272_s14, %s272_s14 }
  0x16   : > { %p2413_p4 = pneg %p2913_p3  ;;  %p2542_p8 = scmp.ne.s32.totalorder %s272_s14, %s2541_s18 }
  0x17   : > { %p2550_p12 = scmp.lt.s32.totalorder %s2541_s18, %s2541_s18 }
  0x18   : > { %p2922_p6 = pnand %p2413_p4, %p3322_p1 }
  0x19   : > { %p2551_p13 = por %p2550_p12, %p2549_p11 }
  0x1a   : > { %p3323_p7 = pneg %p2922_p6 }
  0x1c   : > { %p2544_p9 = pnand %p2542_p8, %p3323_p7 }
  0x1e   : > { %p2545_p10 = pneg %p2544_p9 }
  0x20   : > { %p2552_p0 = pnand %p2551_p13, %p2545_p10 }
  0x22   : > { %2555 = shalt.err (!%p2552_p0)
}
  0x23   : > { %s3313_s19 = smov 128   ;;  %s3315_s20 = smov 8  }
  0x24   : > { %s3337_s3 = sld [smem:[#allocation29_spill]]  ;;  %s2567_s23 = scalar_lea.vmem %s298_s17, 512 }
  0x25   : > { %p2568_p2 = scmp.ne.s32.totalorder %s298_s17, %s2567_s23  ;;  %p2575_p9 = scmp.lt.s32.totalorder %s298_s17, %s298_s17 }
  0x26   : > { %p2576_p10 = scmp.lt.s32.totalorder %s2567_s23, %s2567_s23 }
  0x27   : > { %p2570_p4 = pnand %p2568_p2, %p3323_p7 }
  0x28   : > { %p2577_p11 = por %p2576_p10, %p2575_p9 }
  0x29   : > { %p2571_p8 = pneg %p2570_p4 }
  0x2a   : > { %2416 = dma.hbm_to_vmem [thread:$0]  (!%p2922_p6), %s3337_s3, 512, %s272_s14, [#allocation11], %s3313_s19, %s3313_s19, %s3315_s20  }
  0x2b   : > { %p2578_p12 = pnand %p2577_p11, %p2571_p8 }
  0x2d   : > { %2581 = shalt.err (!%p2578_p12)
}
  0x2e   : > { %s3338_s5 = sld [smem:[#allocation31_spill]]  ;;  %s2218_s26 = sadd.s32 4294967294, %s2810_s10  }
  0x2f   : > { %s41_s13 = sadd.s32 1, %s2806_s9  ;;  %s50_s14 = sadd.s32 1, %s2798_s29 }
  0x30   : > { %p43_p13 = scmp.ge.s32.totalorder %s41_s13, 2  ;;  %p57_p0 = scmp.ne.s32.totalorder %s2798_s29, %s2794_s28 }
  0x31   : > { %p58_p2 = scmp.eq.s32.totalorder %s2810_s10, 0  ;;  %p63_p8 = scmp.ne.s32.totalorder %s2794_s28, %s2790_s27 }
  0x32   : > { %s3373_s13 = smov (%p43_p13, %s41_s13), 0  ;;  %p246_p9 = scmp.eq.s32.totalorder %s2908_s11, 1 }
  0x33   : > { %3339 = sst [smem:[#allocation25_spill]] %s3373_s13  ;;  %p2958_p4 = por %p58_p2, %p57_p0 }
  0x34   : > { %2422 = dma.hbm_to_vmem [thread:$0]  (!%p2922_p6), %s3338_s5, 512, %s298_s17, [#allocation14], %s3313_s19, %s3313_s19, %s3315_s20  }
  0x35   : > { %s45_s17 = ssub.s32 %s2806_s9, %s3373_s13  ;;  %p2969_p11 = por %p3322_p1, %p63_p8 }
  0x36   : > { %p48_p10 = scmp.eq.s32.totalorder %s45_s17, 0  ;;  %p2973_p12 = por %p246_p9, %p57_p0 }
  0x37   : > { %p252_p13 = scmp.eq.s32.totalorder %s2218_s26, 1  ;;  %p2444_p5 = scmp.lt.s32.totalorder %s2810_s10, 2 }
  0x38   : > { %s3342_s21 = scalar_select %p2973_p12, 1, 0 }
  0x39   : > { %s2978_s22 = scalar_select %p48_p10, %s2798_s29, %s50_s14  }
  0x3a   : > { %p2980_p2 = por %p252_p13, %p63_p8  ;;  %s3319_s24 = sand.u32 1, %s2798_s29  }
  0x3b   : > { %3343 = sst [smem:[#allocation26_spill]] %s2978_s22  ;;  %s2987_s25 = sshll.u32 %s2806_s9, 7 }
  0x3c   : > { %s3344_s23 = scalar_select %p2980_p2, 1, 0 }
  0x3d   : > { %s2991_s17 = sshll.u32 %s3319_s24, 3  ;;  %p2995_p0 = pnand %p2444_p5, %p2958_p4 }
  0x3e   : > { %3345 = sst [smem:[#allocation27_spill]] %s3344_s23  ;;  %s346_s26 = sand.u32 1, %s2810_s10  }
  0x3f   : > { %s3347_s1 = sld [smem:[#allocation28_spill]]  ;;  %s350_s5 = scalar_lea.vmem [#allocation7], %s2991_s17 }
  0x40   : > { %s357_s13 = sshll.u32 %s350_s5, 4  ;;  %s3005_s9 = scalar_lea.sflag [#allocation8], %s346_s26  ;;  %s358_s13 = int_to_ptr.vmem [resolvable:$true] %s357_s13 }
  0x41   : > { %p3324_p8 = pneg %p2995_p0  ;;  %s2595_s16 = scalar_lea.vmem %s358_s13, 128 }
  0x42   : > { %p2596_p9 = scmp.ne.s32.totalorder %s358_s13, %s2595_s16  ;;  %s2816_s24 = smov [#allocation7]  }
  0x43   : > { %s2600_s22 = sshll.u32 %s2816_s24, 4  ;;  %s2601_s22 = int_to_ptr.vmem [resolvable:$false] %s2600_s22 }
  0x44   : > { %p2598_p5 = pnand %p2596_p9, %p3324_p8  ;;  %s2602_s10 = scalar_lea.vmem %s2601_s22, 256 }
  0x45   : > { %s355_s3 = scalar_lea.hbm %s3347_s1, %s2987_s25  ;;  %p2603_p10 = scmp.lt.s32.totalorder %s358_s13, %s2601_s22 }
  0x46   : > { %p2599_p4 = pneg %p2598_p5  ;;  %p2604_p13 = scmp.lt.s32.totalorder %s2602_s10, %s2595_s16 }
  0x48   : > { %p2605_p1 = por %p2604_p13, %p2603_p10 }
  0x4a   : > { %p2606_p7 = pnand %p2605_p1, %p2599_p4 }
  0x4c   : > { %2609 = shalt.err (!%p2606_p7)
}
  0x4d   : > { %2432 = dma.hbm_to_vmem [thread:$0]  (!%p2995_p0), %s355_s3, 128, %s358_s13, %s3005_s9  }
  0x4e   : > { %s2817_s5 = smov [#allocation12]   ;;  %s2818_s26 = smov [#allocation15]  }
  0x4f   : > { %s284_s20 = sshll.u32 %s2817_s5, 4  ;;  %s310_s14 = sshll.u32 %s2818_s26, 4  ;;  %s285_s20 = int_to_ptr.vmem [resolvable:$true] %s284_s20  ;;  %s311_s14 = int_to_ptr.vmem [resolvable:$true] %s310_s14 }
  0x50   : > { %s2621_s1 = scalar_lea.vmem %s285_s20, 512  ;;  %p3348_p5 = pneg %p2922_p6 }
  0x51   : > { %p2622_p9 = scmp.ne.s32.totalorder %s285_s20, %s2621_s1  ;;  %p2629_p12 = scmp.lt.s32.totalorder %s285_s20, %s285_s20 }
  0x52   : > { %p2630_p10 = scmp.lt.s32.totalorder %s2621_s1, %s2621_s1 }
  0x53   : > { %p2624_p8 = pnand %p2622_p9, %p3348_p5 }
  0x54   : > { %p2631_p1 = por %p2630_p10, %p2629_p12 }
  0x55   : > { %p2625_p2 = pneg %p2624_p8 }
  0x57   : > { %p2632_p7 = pnand %p2631_p1, %p2625_p2 }
  0x59   : > { %2635 = shalt.err (!%p2632_p7)
}
  0x5a   : > { %s3349_s10 = smov 8   ;;  %s3350_s3 = smov 128  }
  0x5b   : > { %s3351_s4 = sld [smem:[#allocation30_spill]]  ;;  %s2647_s24 = scalar_lea.vmem %s311_s14, 512 }
  0x5c   : > { %p2648_p4 = scmp.ne.s32.totalorder %s311_s14, %s2647_s24  ;;  %p3352_p8 = pmov %p3348_p5 }
  0x5d   : > { %p2655_p12 = scmp.lt.s32.totalorder %s311_s14, %s311_s14  ;;  %p2656_p2 = scmp.lt.s32.totalorder %s2647_s24, %s2647_s24 }
  0x5e   : > { %p2650_p13 = pnand %p2648_p4, %p3352_p8 }
  0x5f   : > { %p2657_p5 = por %p2656_p2, %p2655_p12 }
  0x60   : > { %p2651_p9 = pneg %p2650_p13 }
  0x61   : > { %2419 = dma.hbm_to_vmem [thread:$0]  (!%p2922_p6), %s3351_s4, 512, %s285_s20, [#allocation11], %s3350_s3, %s3350_s3, %s3349_s10  }
  0x62   : > { %p2658_p10 = pnand %p2657_p5, %p2651_p9 }
  0x64   : > { %2661 = shalt.err (!%p2658_p10)
}
  0x65   : > { %2425 = dma.hbm_to_vmem [thread:$0]  (!%p2922_p6), %s3310_s6, 512, %s311_s14, [#allocation14], %s3350_s3, %s3350_s3, %s3349_s10  }
  0x66   : > { %s337_s26 = scalar_lea.hbm %s3304_s0, %s2987_s25  ;;  %s331_s13 = scalar_lea.vmem [#allocation4], %s2991_s17 }
  0x67   : > { %s339_s22 = sshll.u32 %s331_s13, 4  ;;  %s373_s4 = scalar_lea.hbm %s3306_s2, %s2987_s25  ;;  %s340_s22 = int_to_ptr.vmem [resolvable:$true] %s339_s22 }
  0x68   : > { %s3353_s23 = sand.u32 1, %s2798_s29   ;;  %s2675_s1 = scalar_lea.vmem %s340_s22, 128 }
  0x69   : > { %s328_s27 = scalar_lea.sflag [#allocation5], %s3353_s23  ;;  %p2676_p1 = scmp.ne.s32.totalorder %s340_s22, %s2675_s1 }
  0x6a   : > { %p3354_p7 = pneg %p2995_p0  ;;  %s2819_s14 = smov [#allocation4]  }
  0x6b   : > { %s2680_s10 = sshll.u32 %s2819_s14, 4  ;;  %s2681_s10 = int_to_ptr.vmem [resolvable:$false] %s2680_s10 }
  0x6c   : > { %p2678_p4 = pnand %p2676_p1, %p3354_p7  ;;  %s2682_s3 = scalar_lea.vmem %s2681_s10, 256 }
  0x6d   : > { %p2683_p6 = scmp.lt.s32.totalorder %s340_s22, %s2681_s10  ;;  %p2684_p13 = scmp.lt.s32.totalorder %s2682_s3, %s2675_s1 }
  0x6e   : > { %p2679_p8 = pneg %p2678_p4 }
  0x6f   : > { %p2685_p9 = por %p2684_p13, %p2683_p6 }
  0x71   : > { %p2686_p12 = pnand %p2685_p9, %p2679_p8 }
  0x73   : > { %2689 = shalt.err (!%p2686_p12)
}
  0x74   : > { %2429 = dma.hbm_to_vmem [thread:$0]  (!%p2995_p0), %s337_s26, 128, %s340_s22, %s328_s27  }
  0x75   : > { %s368_s23 = scalar_lea.vmem [#allocation9], %s2991_s17  ;;  %p3355_p5 = pmov %p3354_p7 }
  0x76   : > { %s375_s16 = sshll.u32 %s368_s23, 4  ;;  %s2820_s20 = smov [#allocation9]   ;;  %s376_s16 = int_to_ptr.vmem [resolvable:$true] %s375_s16 }
  0x77   : > { %s2703_s5 = scalar_lea.vmem %s376_s16, 128  ;;  %s2708_s13 = sshll.u32 %s2820_s20, 4  ;;  %s2709_s13 = int_to_ptr.vmem [resolvable:$false] %s2708_s13 }
  0x78   : > { %p2704_p2 = scmp.ne.s32.totalorder %s376_s16, %s2703_s5  ;;  %s2710_s15 = scalar_lea.vmem %s2709_s13, 256 }
  0x79   : > { %p2711_p7 = scmp.lt.s32.totalorder %s376_s16, %s2709_s13  ;;  %p2712_p4 = scmp.lt.s32.totalorder %s2710_s15, %s2703_s5 }
  0x7a   : > { %p2706_p10 = pnand %p2704_p2, %p3355_p5 }
  0x7b   : > { %p2713_p8 = por %p2712_p4, %p2711_p7 }
  0x7c   : > { %p2707_p1 = pneg %p2706_p10 }
  0x7e   : > { %p2714_p6 = pnand %p2713_p8, %p2707_p1 }
  0x80   : > { %2717 = shalt.err (!%p2714_p6)
}
  0x81   : > { %2435 = dma.hbm_to_vmem [thread:$0]  (!%p2995_p0), %s373_s4, 128, %s376_s16, %s3005_s9  }
  0x82   : > { %384 = sbr.rel (%p2913_p3) target bundleno = 1400 (0x578), region = 52  ;;  %s3068_s26 = sand.u32 (!%p2913_p3), 1, %s2794_s28  }
  0x83   : > { %s3071_s22 = sshll.u32 (!%p2913_p3), %s3068_s26, 3  ;;  %s387_s19 = scalar_lea.sflag (!%p2913_p3), [#allocation5], %s3068_s26 }
  0x84   : > { %s390_s24 = scalar_lea.vmem (!%p2913_p3), [#allocation4], %s3071_s22 }
  0x87   : > { %2769 = dma.done.wait (%p2969_p11), %s387_s19, 128  }
  0x88   : > { %2771 = vsyncadd (%p2969_p11), %s387_s19, 4294967168  ;;  %s395_s4 = sand.u32 1, %s2908_s11   ;;  %s399_s12 = scalar_lea.vmem [#allocation7], %s3071_s22 }
  0x89   : > { %s396_s9 = scalar_lea.sflag [#allocation8], %s395_s4 }
  0x8a   : > { %2773 = dma.done.wait (%p2969_p11), %s396_s9, 256  }
  0x8b   : > { %2775 = vsyncadd (%p2969_p11), %s396_s9, 4294967040  ;;  %s408_s25 = scalar_lea.vmem [#allocation9], %s3071_s22  ;;  %p3356_p3 = scmp.eq.s32.totalorder %s2908_s11, 0 }
  0x8d   : > { %2777 = dma.done.wait (%p3356_p3), [#allocation11], 1024   ;;  %p3357_p0 = pmov %p3356_p3 }
  0x8f   : > { %2779 = vsyncadd (%p3357_p0), [#allocation11], 4294966272  ;;  %p3358_p13 = pmov %p3357_p0 }
  0x90   : > { %p3359_p9 = pmov %p3357_p0 }
  0x91   : > { %2781 = dma.done.wait (%p3358_p13), [#allocation14], 1024  }
  0x92   : > { %2783 = vsyncadd (%p3359_p9), [#allocation14], 4294966272  ;;  %v2821_v0 = vmov 0.0   ;;  %vm2822_vm0 = vmmov 0   ;;  %v475_v1 = vld [vmem:[#allocation12 + $0x18] sm:$0xff]  ;;  %v474_v2 = vld [vmem:[#allocation12 + $0x10] sm:$0xff]  ;;  %v643_v24 = vlaneseq }
  0x93   : > { %2305 = vmatprep.subr.mxu0 %v2821_v0  ;;  %2313 = vmatprep.mubr.msk.f32.mxu0 %vm2822_vm0, %v2821_v0  ;;  %v473_v3 = vld [vmem:[#allocation12 + $0x8] sm:$0xff]  ;;  %v554_v4 = vld [vmem:[#allocation13 + $0x18] sm:$0xff]  ;;  %v553_v5 = vld [vmem:[#allocation13 + $0x10] sm:$0xff]  ;;  %vm476_vm1 = vcmask 261120   ;;  %s2823_s11 = smov 104   ;;  %s2824_s18 = smov 120  }
  0x94   : > { %2316 = vmatprep.subr.mxu1 %v2821_v0  ;;  %2324 = vmatprep.mubr.msk.f32.mxu1 %vm2822_vm0, %v2821_v0  ;;  %v472_v6 = vld [vmem:[#allocation12] sm:$0xff]  ;;  %v933_v8 = vld [vmem:[#allocation10 + $0x18] sm:$0xff]  ;;  %v932_v9 = vld [vmem:[#allocation10 + $0x10] sm:$0xff]  ;;  %s2825_s1 = smov 112   ;;  %v2826_v22 = vmov 1983009808  }
  0x95   : > { %2306 = vmatpush3.msra.mxu0 %v475_v1  ;;  %2317 = vmatpush3.msra.mxu1 %v554_v4  ;;  %v471_v7 = vld [vmem:[%s399_s12] sm:$0xff]  ;;  %v929_v12 = vld [vmem:[%s390_s24] sm:$0xff]  ;;  %v641_v23 = vunpack.c.l.s4 %v2826_v22  ;;  %v2827_v25 = vmov 1934713408   ;;  %v644_v28 = vshrl.u32 %v643_v24, 7  ;;  %vm774_vm2 = vcmask 64512  }
  0x96   : > { %2307 = vmatprep.subr.mxu0 %v2821_v0  ;;  %2318 = vmatprep.subr.mxu1 %v2821_v0  ;;  %v931_v10 = vld [vmem:[#allocation10 + $0x8] sm:$0xff]  ;;  %v930_v11 = vld [vmem:[#allocation10] sm:$0xff]  ;;  %v550_v15 = vld [vmem:[%s408_s25] sm:$0xff]  ;;  %v673_v26 = vunpack.c.l.s4 %v2827_v25  ;;  %s2828_s14 = smov 16   ;;  %s2829_s10 = smov 8   ;;  %vm1952_vm3 = vcmask 130048  }
  0x97   : > { %2308 = vmatpush3.msra.mxu0 %v474_v2  ;;  %2319 = vmatpush3.msra.mxu1 %v553_v5  ;;  %v552_v13 = vld [vmem:[#allocation13 + $0x8] sm:$0xff]  ;;  %v551_v14 = vld [vmem:[#allocation13] sm:$0xff]  ;;  %v642_v27 = vunpack.c.0.s8 %v641_v23  ;;  %s2830_s3 = smov 24   ;;  %vm1954_vm4 = vcmask 195584   ;;  %s2266_s5 = sshll.u32 %s2802_s30, 7 }
  0x98   : > { %2309 = vmatprep.subr.mxu0 %v2821_v0  ;;  %2320 = vmatprep.subr.mxu1 %v2821_v0  ;;  %v674_v31 = vunpack.c.0.s8 %v673_v26  ;;  %s466_s20 = scalar_lea.vmem [#allocation16], %s3071_s22  ;;  %s3262_s17 = scalar_lea.hbm %s3312_s8, %s2266_s5 }
  0x99   : > { %2310 = vmatpush3.msra.mxu0 %v473_v3  ;;  %2321 = vmatpush3.msra.mxu1 %v552_v13  ;;  %v3130_v32 = vsub.s32 %v642_v27, %v644_v28  ;;  %s2056_s13 = sshll.u32 %s466_s20, 4  ;;  %s2042_s19 = scalar_lea.sflag [#allocation6], %s3068_s26  ;;  %s2057_s13 = int_to_ptr.vmem [resolvable:$true] %s2056_s13 }
  0x9a   : > { %2311 = vmatprep.subr.mxu0 %v2821_v0  ;;  %2322 = vmatprep.subr.mxu1 %v2821_v0  ;;  %v3132_v38 = vsub.s32 %v674_v31, %v644_v28  ;;  %s2718_s24 = scalar_lea.vmem %s2057_s13, 128  ;;  %p3360_p12 = scmp.ne.s32.totalorder %s3342_s21, 0 }
  0x9b   : > { %2312 = vmatpush3.msra.mxu0 %v472_v6  ;;  %2323 = vmatpush3.msra.mxu1 %v551_v14  ;;  %p2719_p11 = scmp.ne.s32.totalorder %s2057_s13, %s2718_s24  ;;  %s2831_s4 = smov [#allocation16]  }
  0x9c   : > { %2314 = vmatmul.mubr.msk.f32.vlgmr.msra.gmra.mxu0 %vm476_vm1, %v471_v7  ;;  %2327 = vmatprep.subr.mxu0 %v2821_v0  ;;  %s2722_s30 = sshll.u32 %s2831_s4, 4  ;;  %s2723_s30 = int_to_ptr.vmem [resolvable:$false] %s2722_s30 }
  0x9d   : > { %2328 = vmatpush3.msra.mxu0 %v933_v8  ;;  %2335 = vmatprep.mubr.msk.f32.mxu0 %vm2822_vm0, %v2821_v0  ;;  %p2720_p2 = pnand %p2719_p11, %p3360_p12  ;;  %s2724_s22 = scalar_lea.vmem %s2723_s30, 256 }
  0x9e   : > { %2329 = vmatprep.subr.mxu0 %v2821_v0  ;;  %2325 = vmatmul.mubr.msk.f32.vlgmr.msra.gmra.mxu1 %vm476_vm1, %v550_v15  ;;  %p2725_p10 = scmp.lt.s32.totalorder %s2057_s13, %s2723_s30  ;;  %p2726_p1 = scmp.lt.s32.totalorder %s2724_s22, %s2718_s24 }
  0x9f   : > { %2330 = vmatpush3.msra.mxu0 %v932_v9  ;;  %2338 = vmatprep.subr.mxu1 %v2821_v0  ;;  %p2721_p5 = pneg %p2720_p2 }
  0xa0   : > { %2331 = vmatprep.subr.mxu0 %v2821_v0  ;;  %2340 = vmatprep.mubr.msk.f32.mxu1 %vm2822_vm0, %v2821_v0  ;;  %p2727_p7 = por %p2726_p1, %p2725_p10 }
  0xa1   : > { %2332 = vmatpush3.msra.mxu0 %v931_v10 }
  0xa2   : > { %2333 = vmatprep.subr.mxu0 %v2821_v0  ;;  %p2728_p4 = pnand %p2727_p7, %p2721_p5 }
  0xa3   : > { %2334 = vmatpush3.msra.mxu0 %v930_v11 }
  0xa4   : > { %2336 = vmatmul.mubr.msk.f32.vlgmr.msra.gmra.mxu0 %vm476_vm1, %v929_v12  ;;  %2358 = vmatprep.subr.mxu0 %v2821_v0 }
  0xa5   : > { %2360 = vmatprep.mubr.msk.f32.mxu0 %vm2822_vm0, %v2821_v0 }
 0x15c   : > { %v546_v16 = vpop.f32.mrf.mxu0 }
 0x15d   : > { %635 = vrot.lane.b32.xlu1 %v546_v16, %s2823_s11  ;;  %629 = vrot.lane.b32.xlu0 %v546_v16, %s2824_s18 }
 0x15e   : > { %v2315_v17 = vpop.f32.mrf.mxu0  ;;  %v3125_v20 = vpop.f32.mrf.mxu1 }
 0x160   : > { %v2326_v21 = vpop.f32.mrf.mxu1 }
 0x161   : > { %632 = vrot.lane.b32.xlu0 %v546_v16, %s2825_s1 }
 0x164   : > { %v1004_v18 = vpop.f32.mrf.mxu0 }
 0x165   : > { %1012 = vrot.lane.b32.xlu0 %v1004_v18, %s2825_s1  ;;  %1009 = vrot.lane.b32.xlu1 %v1004_v18, %s2824_s18 }
 0x166   : > { %v2337_v19 = vpop.f32.mrf.mxu0 }
 0x169   : > { %1015 = vrot.lane.b32.xlu1 %v1004_v18, %s2823_s11  ;;  %780 = vrot.lane.b32.xlu0 %v3125_v20, %s2824_s18 }
 0x16d   : > { %783 = vrot.lane.b32.xlu1 %v3125_v20, %s2825_s1  ;;  %786 = vrot.lane.b32.xlu0 %v3125_v20, %s2823_s11 }
 0x1cf   : > { %v636_v29 = vpop.permute.xlu1 %635  ;;  %v630_v30 = vpop.permute.xlu0 %629 }
 0x1d0   : > { %v654_v33 = vcombine.low %v630_v30, %v636_v29  ;;  %v655_v34 = vcombine.high %v630_v30, %v636_v29 }
 0x1d2   : > { %v662_v39 = vrot.slane %v654_v33, %v3130_v32  ;;  %v669_v40 = vrot.slane %v655_v34, %v3130_v32 }
 0x1d3   : > { %v633_v35 = vpop.permute.xlu0 %632 }
 0x1d4   : > { %v638_v36 = vcombine.low %v546_v16, %v633_v35  ;;  %v639_v37 = vcombine.high %v546_v16, %v633_v35 }
 0x1d6   : > { %v646_v41 = vrot.slane %v638_v36, %v3130_v32  ;;  %v653_v42 = vrot.slane %v639_v37, %v3130_v32 }
 0x1d7   : > { %v1010_v43 = vpop.permute.xlu1 %1009  ;;  %v1013_v48 = vpop.permute.xlu0 %1012 }
 0x1d8   : > { %v670_v44 = vcombine.low %v646_v41, %v662_v39  ;;  %v671_v45 = vcombine.high %v646_v41, %v662_v39  ;;  %v686_v46 = vcombine.low %v653_v42, %v669_v40  ;;  %v687_v47 = vcombine.high %v653_v42, %v669_v40 }
 0x1d9   : > { %v1018_v53 = vcombine.low %v1004_v18, %v1013_v48  ;;  %v1019_v54 = vcombine.high %v1004_v18, %v1013_v48 }
 0x1da   : > { %v678_v49 = vrot.slane %v670_v44, %v3132_v38  ;;  %v685_v50 = vrot.slane %v671_v45, %v3132_v38  ;;  %v694_v51 = vrot.slane %v686_v46, %v3132_v38  ;;  %v701_v52 = vrot.slane %v687_v47, %v3132_v38 }
 0x1db   : > { %v1016_v55 = vpop.permute.xlu1 %1015  ;;  %v1026_v3 = vrot.slane %v1018_v53, %v3130_v32  ;;  %v1033_v4 = vrot.slane %v1019_v54, %v3130_v32  ;;  %v781_v54 = vpop.permute.xlu0 %780 }
 0x1dc   : > { %v706_v56 = vcombine.low %v678_v49, %v685_v50  ;;  %v2242_v57 = vcombine.high %v678_v49, %v685_v50  ;;  %v722_v58 = vcombine.low %v694_v51, %v701_v52  ;;  %v2243_v59 = vcombine.high %v694_v51, %v701_v52 }
 0x1dd   : > { %v1034_v60 = vcombine.low %v1010_v43, %v1016_v55  ;;  %v1035_v61 = vcombine.high %v1010_v43, %v1016_v55 }
 0x1de   : > { %v713_v62 = vrot.slane %v706_v56, %v3130_v32  ;;  %v721_v63 = vrot.slane %v2242_v57, %v3130_v32  ;;  %v729_v1 = vrot.slane %v722_v58, %v3130_v32  ;;  %v737_v2 = vrot.slane %v2243_v59, %v3130_v32 }
 0x1df   : > { %v1042_v5 = vrot.slane %v1034_v60, %v3130_v32  ;;  %v1049_v6 = vrot.slane %v1035_v61, %v3130_v32  ;;  %v784_v55 = vpop.permute.xlu1 %783  ;;  %v787_v58 = vpop.permute.xlu0 %786 }
 0x1e0   : > { %v738_v7 = vcombine.low %v713_v62, %v721_v63  ;;  %v739_v8 = vcombine.high %v713_v62, %v721_v63  ;;  %v754_v9 = vcombine.low %v729_v1, %v737_v2  ;;  %v755_v10 = vcombine.high %v729_v1, %v737_v2 }
 0x1e1   : > { %v1050_v11 = vcombine.low %v1026_v3, %v1042_v5  ;;  %v1051_v12 = vcombine.high %v1026_v3, %v1042_v5  ;;  %v1066_v13 = vcombine.low %v1033_v4, %v1049_v6  ;;  %v1067_v14 = vcombine.high %v1033_v4, %v1049_v6 }
 0x1e2   : > { %v746_v15 = vrot.slane %v738_v7, %v3132_v38  ;;  %v753_v16 = vrot.slane %v739_v8, %v3132_v38  ;;  %v762_v17 = vrot.slane %v754_v9, %v3132_v38  ;;  %v769_v18 = vrot.slane %v755_v10, %v3132_v38 }
 0x1e3   : > { %v1058_v19 = vrot.slane %v1050_v11, %v3132_v38  ;;  %v1065_v21 = vrot.slane %v1051_v12, %v3132_v38  ;;  %v1074_v22 = vrot.slane %v1066_v13, %v3132_v38  ;;  %v1081_v23 = vrot.slane %v1067_v14, %v3132_v38 }
 0x1e4   : > { %v770_v24 = vcombine.low %v746_v15, %v762_v17  ;;  %v771_v25 = vcombine.high %v746_v15, %v762_v17  ;;  %v772_v26 = vcombine.low %v753_v16, %v769_v18  ;;  %v773_v27 = vcombine.high %v753_v16, %v769_v18 }
 0x1e5   : > { %v1086_v28 = vcombine.low %v1058_v19, %v1065_v21  ;;  %v2247_v29 = vcombine.high %v1058_v19, %v1065_v21  ;;  %v1102_v30 = vcombine.low %v1074_v22, %v1081_v23  ;;  %v2248_v31 = vcombine.high %v1074_v22, %v1081_v23 }
 0x1e6   : > { %775 = vst.msk [vmem:[#allocation2] sm:$0xff] %vm774_vm2, %v770_v24  ;;  %776 = vst.msk [vmem:[#allocation2 + $0x8] sm:$0xff] %vm774_vm2, %v771_v25  ;;  %v789_v56 = vcombine.low %v3125_v20, %v784_v55  ;;  %v790_v57 = vcombine.high %v3125_v20, %v784_v55  ;;  %v805_v59 = vcombine.low %v781_v54, %v787_v58 }
 0x1e7   : > { %777 = vst.msk [vmem:[#allocation2 + $0x10] sm:$0xff] %vm774_vm2, %v772_v26  ;;  %778 = vst.msk [vmem:[#allocation2 + $0x18] sm:$0xff] %vm774_vm2, %v773_v27  ;;  %v1093_v33 = vrot.slane %v1086_v28, %v3130_v32  ;;  %v1101_v34 = vrot.slane %v2247_v29, %v3130_v32  ;;  %v1109_v35 = vrot.slane %v1102_v30, %v3130_v32 }
 0x1e8   : > { %v1117_v36 = vrot.slane %v2248_v31, %v3130_v32  ;;  %v806_v60 = vcombine.high %v781_v54, %v787_v58  ;;  %v797_v61 = vrot.slane %v789_v56, %v3130_v32  ;;  %v804_v62 = vrot.slane %v790_v57, %v3130_v32 }
 0x1e9   : > { %v1118_v37 = vcombine.low %v1093_v33, %v1101_v34  ;;  %v1119_v43 = vcombine.high %v1093_v33, %v1101_v34  ;;  %v813_v63 = vrot.slane %v805_v59, %v3130_v32 }
 0x1ea   : > { %v1134_v39 = vcombine.low %v1109_v35, %v1117_v36  ;;  %v1135_v44 = vcombine.high %v1109_v35, %v1117_v36  ;;  %v820_v1 = vrot.slane %v806_v60, %v3130_v32 }
 0x1eb   : > { %v1126_v40 = vrot.slane %v1118_v37, %v3132_v38  ;;  %v1133_v48 = vrot.slane %v1119_v43, %v3132_v38  ;;  %v821_v2 = vcombine.low %v797_v61, %v813_v63  ;;  %v822_v3 = vcombine.high %v797_v61, %v813_v63 }
 0x1ec   : > { %v1142_v41 = vrot.slane %v1134_v39, %v3132_v38  ;;  %v1149_v49 = vrot.slane %v1135_v44, %v3132_v38  ;;  %v837_v4 = vcombine.low %v804_v62, %v820_v1  ;;  %v838_v5 = vcombine.high %v804_v62, %v820_v1 }
 0x1ed   : > { %v1154_v42 = vld [vmem:[#allocation2] sm:$0xff]  ;;  %v1155_v46 = vld [vmem:[#allocation2 + $0x8] sm:$0xff]  ;;  %v829_v6 = vrot.slane %v821_v2, %v3132_v38  ;;  %v836_v7 = vrot.slane %v822_v3, %v3132_v38 }
 0x1ee   : > { %2339 = vmatpush3.xpose.msk.msra.mxu1 %vm774_vm2, %v1154_v42  ;;  %v1150_v45 = vcombine.low %v1126_v40, %v1142_v41  ;;  %v1151_v47 = vcombine.high %v1126_v40, %v1142_v41  ;;  %v1156_v50 = vld [vmem:[#allocation2 + $0x10] sm:$0xff]  ;;  %v1152_v51 = vcombine.low %v1133_v48, %v1149_v49  ;;  %v1157_v52 = vld [vmem:[#allocation2 + $0x18] sm:$0xff]  ;;  %v1153_v53 = vcombine.high %v1133_v48, %v1149_v49 }
 0x1ef   : > { %2343 = vmatprep.subr.mxu1 %v2821_v0  ;;  %v845_v20 = vrot.slane %v837_v4, %v3132_v38  ;;  %v852_v8 = vrot.slane %v838_v5, %v3132_v38  ;;  %v857_v9 = vcombine.low %v829_v6, %v836_v7  ;;  %v2244_v10 = vcombine.high %v829_v6, %v836_v7  ;;  %v1959_v5 = vld [vmem:[#allocation15 + $0x18] sm:$0xff] }
 0x1f1   : > { %2341 = vmatmul.mubr.msk.f32.vlgmr.msra.gmra.mxu1 %vm774_vm2, %v1150_v45  ;;  %v873_v11 = vcombine.low %v845_v20, %v852_v8  ;;  %v2245_v12 = vcombine.high %v845_v20, %v852_v8  ;;  %v864_v13 = vrot.slane %v857_v9, %v3130_v32  ;;  %v872_v14 = vrot.slane %v2244_v10, %v3130_v32 }
 0x1f2   : > { %2344 = vmatpush3.xpose.msk.msra.mxu1 %vm774_vm2, %v1155_v46  ;;  %2345 = vmatprep.mubr.msk.f32.mxu1 %vm2822_vm0, %v2821_v0 }
 0x1f3   : > { %2348 = vmatprep.subr.mxu1 %v2821_v0  ;;  %v880_v15 = vrot.slane %v873_v11, %v3130_v32  ;;  %v888_v16 = vrot.slane %v2245_v12, %v3130_v32  ;;  %v889_v17 = vcombine.low %v864_v13, %v872_v14  ;;  %v890_v18 = vcombine.high %v864_v13, %v872_v14 }
 0x1f5   : > { %2346 = vmatmul.mubr.msk.f32.vlgmr.msra.gmra.mxu1 %vm774_vm2, %v1151_v47  ;;  %v905_v19 = vcombine.low %v880_v15, %v888_v16  ;;  %v906_v21 = vcombine.high %v880_v15, %v888_v16  ;;  %v897_v22 = vrot.slane %v889_v17, %v3132_v38  ;;  %v904_v23 = vrot.slane %v890_v18, %v3132_v38 }
 0x1f6   : > { %2349 = vmatpush3.xpose.msk.msra.mxu1 %vm774_vm2, %v1156_v50  ;;  %2350 = vmatprep.mubr.msk.f32.mxu1 %vm2822_vm0, %v2821_v0 }
 0x1f7   : > { %2353 = vmatprep.subr.mxu1 %v2821_v0  ;;  %v913_v24 = vrot.slane %v905_v19, %v3132_v38  ;;  %v920_v25 = vrot.slane %v906_v21, %v3132_v38 }
 0x1f9   : > { %2351 = vmatmul.mubr.msk.f32.vlgmr.msra.gmra.mxu1 %vm774_vm2, %v1152_v51  ;;  %v921_v26 = vcombine.low %v897_v22, %v913_v24  ;;  %v922_v27 = vcombine.high %v897_v22, %v913_v24  ;;  %v923_v28 = vcombine.low %v904_v23, %v920_v25  ;;  %v924_v29 = vcombine.high %v904_v23, %v920_v25 }
 0x1fa   : > { %2354 = vmatpush3.xpose.msk.msra.mxu1 %vm774_vm2, %v1157_v52  ;;  %2355 = vmatprep.mubr.msk.f32.mxu1 %vm2822_vm0, %v2821_v0 }
 0x1fb   : > { %2363 = vmatprep.subr.mxu1 %v2821_v0  ;;  %925 = vst.msk [vmem:[#allocation3] sm:$0xff] %vm774_vm2, %v921_v26  ;;  %926 = vst.msk [vmem:[#allocation3 + $0x8] sm:$0xff] %vm774_vm2, %v922_v27 }
 0x1fc   : > { %927 = vst.msk [vmem:[#allocation3 + $0x10] sm:$0xff] %vm774_vm2, %v923_v28  ;;  %928 = vst.msk [vmem:[#allocation3 + $0x18] sm:$0xff] %vm774_vm2, %v924_v29 }
 0x1fd   : > { %2356 = vmatmul.mubr.msk.f32.vlgmr.msra.gmra.mxu1 %vm774_vm2, %v1153_v53 }
 0x1fe   : > { %2365 = vmatprep.mubr.msk.f32.mxu1 %vm2822_vm0, %v2821_v0 }
 0x202   : > { %v1503_v30 = vld [vmem:[#allocation3] sm:$0xff]  ;;  %v1504_v31 = vld [vmem:[#allocation3 + $0x8] sm:$0xff] }
 0x203   : > { %2359 = vmatpush3.msra.mxu0 %v1503_v30  ;;  %2364 = vmatpush3.msra.mxu1 %v1504_v31  ;;  %v1505_v59 = vld [vmem:[#allocation3 + $0x10] sm:$0xff]  ;;  %v1506_v62 = vld [vmem:[#allocation3 + $0x18] sm:$0xff] }
 0x204   : > { %2368 = vmatprep.subr.mxu0 %v2821_v0  ;;  %2373 = vmatprep.subr.mxu1 %v2821_v0 }
 0x2b1   : > { %v1231_v33 = vpop.f32.mrf.mxu1 }
 0x2b2   : > { %v1463_v34 = vsel %vm774_vm2, %v1231_v33, -inf }
 0x2b3   : > { %1464 = vmax.xlane.f32.xlu0 %v1463_v34  ;;  %v2342_v35 = vpop.f32.mrf.mxu1 }
 0x2b5   : > { %v1307_v36 = vpop.f32.mrf.mxu1 }
 0x2b6   : > { %v1466_v37 = vsel %vm774_vm2, %v1307_v36, -inf }
 0x2b7   : > { %1467 = vmax.xlane.f32.xlu1 %v1466_v37  ;;  %v2347_v39 = vpop.f32.mrf.mxu1 }
 0x2b9   : > { %v1383_v40 = vpop.f32.mrf.mxu1 }
 0x2ba   : > { %v1469_v41 = vsel %vm774_vm2, %v1383_v40, -inf }
 0x2bb   : > { %1470 = vmax.xlane.f32.xlu1 %v1469_v41  ;;  %v2352_v42 = vpop.f32.mrf.mxu1  ;;  %v1957_v41 = vld [vmem:[#allocation15 + $0x8] sm:$0xff] }
 0x2bd   : > { %v1459_v43 = vpop.f32.mrf.mxu1 }
 0x2be   : > { %v1472_v44 = vsel %vm774_vm2, %v1459_v43, -inf }
 0x2bf   : > { %1473 = vmax.xlane.f32.xlu0 %v1472_v44  ;;  %v2357_v45 = vpop.f32.mrf.mxu1 }
 0x33c   : > { %v1465_v46 = vpop.xlane.xlu0 %1464 }
 0x33d   : > { %v1475_v47 = vsub.f32 %v1231_v33, %v1465_v46 }
 0x33f   : > { %v1479_v48 = vmul.f32 1.442695, %v1475_v47 }
 0x340   : > { %v1468_v49 = vpop.xlane.xlu1 %1467 }
 0x341   : > { %2514 = vpow2.f32 %v1479_v48  ;;  %v1476_v50 = vsub.f32 %v1307_v36, %v1468_v49 }
 0x343   : > { %v1481_v51 = vmul.f32 1.442695, %v1476_v50  ;;  %v1956_v50 = vld [vmem:[#allocation15] sm:$0xff] }
 0x344   : > { %v1471_v52 = vpop.xlane.xlu1 %1470 }
 0x345   : > { %2516 = vpow2.f32 %v1481_v51  ;;  %v1477_v53 = vsub.f32 %v1383_v40, %v1471_v52  ;;  %v1958_v40 = vld [vmem:[#allocation15 + $0x10] sm:$0xff] }
 0x347   : > { %v1483_v54 = vmul.f32 1.442695, %v1477_v53 }
 0x348   : > { %v1474_v55 = vpop.xlane.xlu0 %1473 }
 0x349   : > { %2518 = vpow2.f32 %v1483_v54  ;;  %v1478_v56 = vsub.f32 %v1459_v43, %v1474_v55 }
 0x34b   : > { %v1485_v57 = vmul.f32 1.442695, %v1478_v56 }
 0x34d   : > { %2520 = vpow2.f32 %v1485_v57 }
 0x34e   : > { %v2515_v58 = vpop.eup %2514 }
 0x34f   : > { %2361 = vmatmul.mubr.msk.f32.vlgmr.msra.gmra.mxu0 %vm774_vm2, %v2515_v58  ;;  %v1487_v60 = vsel %vm774_vm2, %v2515_v58, 0.0 }
 0x350   : > { %2369 = vmatpush3.msra.mxu0 %v1505_v59  ;;  %1488 = vadd.xlane.f32.xlu0 %v1487_v60 }
 0x351   : > { %2370 = vmatprep.mubr.msk.f32.mxu0 %vm2822_vm0, %v2821_v0  ;;  %2378 = vmatprep.subr.mxu0 %v2821_v0 }
 0x352   : > { %v2517_v61 = vpop.eup %2516 }
 0x353   : > { %2366 = vmatmul.mubr.msk.f32.vlgmr.msra.gmra.mxu1 %vm774_vm2, %v2517_v61  ;;  %v1490_v63 = vsel %vm774_vm2, %v2517_v61, 0.0 }
 0x354   : > { %2374 = vmatpush3.msra.mxu1 %v1506_v62  ;;  %1491 = vadd.xlane.f32.xlu1 %v1490_v63 }
 0x355   : > { %2375 = vmatprep.mubr.msk.f32.mxu1 %vm2822_vm0, %v2821_v0 }
 0x356   : > { %v2519_v1 = vpop.eup %2518 }
 0x357   : > { %2371 = vmatmul.mubr.msk.f32.vlgmr.msra.gmra.mxu0 %vm774_vm2, %v2519_v1  ;;  %v1493_v2 = vsel %vm774_vm2, %v2519_v1, 0.0 }
 0x358   : > { %1494 = vadd.xlane.f32.xlu0 %v1493_v2  ;;  %2386 = vmatprep.mubr.msk.f32.mxu0 %vm2822_vm0, %v2821_v0 }
 0x359   : > { %2379 = vmatpush3.msra.mxu0 %v1959_v5 }
 0x35a   : > { %v2521_v3 = vpop.eup %2520  ;;  %2380 = vmatprep.subr.mxu0 %v2821_v0 }
 0x35b   : > { %2376 = vmatmul.mubr.msk.f32.vlgmr.msra.gmra.mxu1 %vm774_vm2, %v2521_v3  ;;  %v1496_v4 = vsel %vm774_vm2, %v2521_v3, 0.0  ;;  %2381 = vmatpush3.msra.mxu0 %v1958_v40 }
 0x35c   : > { %1497 = vadd.xlane.f32.xlu1 %v1496_v4  ;;  %2382 = vmatprep.subr.mxu0 %v2821_v0 }
 0x35d   : > { %2383 = vmatpush3.msra.mxu0 %v1957_v41 }
 0x35e   : > { %2384 = vmatprep.subr.mxu0 %v2821_v0 }
 0x35f   : > { %2385 = vmatpush3.msra.mxu0 %v1956_v50 }
 0x3d9   : > { %v1489_v6 = vpop.xlane.xlu0 %1488 }
 0x3dd   : > { %v1492_v7 = vpop.xlane.xlu1 %1491 }
 0x3e1   : > { %v1495_v20 = vpop.xlane.xlu0 %1494 }
 0x3e2   : > { %2522 = vrcp.f32 %v1495_v20 }
 0x3e3   : > { %2524 = vrcp.f32 %v1489_v6 }
 0x3e4   : > { %2526 = vrcp.f32 %v1492_v7  ;;  %v2263_v7 = vld [vmem:[%s3311_s7] ss:$0 sm:$0xff] }
 0x3e5   : > { %v1498_v8 = vpop.xlane.xlu1 %1497 }
 0x3e6   : > { %2528 = vrcp.f32 %v1498_v8 }
 0x3ef   : > { %v2523_v13 = vpop.eup %2522 }
 0x3f0   : > { %v2525_v16 = vpop.eup %2524 }
 0x3f1   : > { %v2527_v18 = vpop.eup %2526 }
 0x3f3   : > { %v2529_v21 = vpop.eup %2528 }
 0x40f   : > { %v1576_v9 = vpop.f32.mrf.mxu0 }
 0x410   : > { %v1799_v19 = vmul.f32 %v2525_v16, %v1576_v9 }
 0x411   : > { %v2362_v10 = vpop.f32.mrf.mxu0 }
 0x413   : > { %v1649_v11 = vpop.f32.mrf.mxu1 }
 0x414   : > { %v1800_v23 = vmul.f32 %v2527_v18, %v1649_v11 }
 0x415   : > { %v2367_v12 = vpop.f32.mrf.mxu1 }
 0x417   : > { %v1722_v14 = vpop.f32.mrf.mxu0 }
 0x418   : > { %v1801_v15 = vmul.f32 %v2523_v13, %v1722_v14 }
 0x419   : > { %v2372_v17 = vpop.f32.mrf.mxu0 }
 0x41a   : > { %v1803_v24 = vcombine.low %v1799_v19, %v1801_v15  ;;  %v1804_v25 = vcombine.high %v1799_v19, %v1801_v15 }
 0x41b   : > { %v1795_v22 = vpop.f32.mrf.mxu1 }
 0x41c   : > { %v1802_v26 = vmul.f32 %v2529_v21, %v1795_v22  ;;  %v1811_v30 = vrot.slane %v1803_v24, %v3130_v32  ;;  %v1818_v31 = vrot.slane %v1804_v25, %v3130_v32 }
 0x41d   : > { %v2377_v27 = vpop.f32.mrf.mxu1 }
 0x41e   : > { %v1819_v28 = vcombine.low %v1800_v23, %v1802_v26  ;;  %v1820_v29 = vcombine.high %v1800_v23, %v1802_v26 }
 0x420   : > { %v1827_v33 = vrot.slane %v1819_v28, %v3130_v32  ;;  %v1834_v34 = vrot.slane %v1820_v29, %v3130_v32 }
 0x422   : > { %v1835_v35 = vcombine.low %v1811_v30, %v1827_v33  ;;  %v1836_v36 = vcombine.high %v1811_v30, %v1827_v33  ;;  %v1851_v37 = vcombine.low %v1818_v31, %v1834_v34  ;;  %v1852_v39 = vcombine.high %v1818_v31, %v1834_v34 }
 0x424   : > { %v1843_v42 = vrot.slane %v1835_v35, %v3132_v38  ;;  %v1850_v43 = vrot.slane %v1836_v36, %v3132_v38  ;;  %v1859_v44 = vrot.slane %v1851_v37, %v3132_v38  ;;  %v1866_v45 = vrot.slane %v1852_v39, %v3132_v38 }
 0x426   : > { %v1871_v46 = vcombine.low %v1843_v42, %v1850_v43  ;;  %v2261_v47 = vcombine.high %v1843_v42, %v1850_v43  ;;  %v1887_v48 = vcombine.low %v1859_v44, %v1866_v45  ;;  %v2262_v49 = vcombine.high %v1859_v44, %v1866_v45 }
 0x428   : > { %v1878_v51 = vrot.slane %v1871_v46, %v3130_v32  ;;  %v1886_v52 = vrot.slane %v2261_v47, %v3130_v32  ;;  %v1894_v53 = vrot.slane %v1887_v48, %v3130_v32  ;;  %v1902_v54 = vrot.slane %v2262_v49, %v3130_v32 }
 0x42a   : > { %v1904_v55 = vcombine.high %v1878_v51, %v1886_v52  ;;  %v1920_v56 = vcombine.high %v1894_v53, %v1902_v54  ;;  %v1903_v57 = vcombine.low %v1878_v51, %v1886_v52  ;;  %v1919_v58 = vcombine.low %v1894_v53, %v1902_v54 }
 0x42c   : > { %v1918_v59 = vrot.slane %v1904_v55, %v3132_v38  ;;  %v1934_v60 = vrot.slane %v1920_v56, %v3132_v38  ;;  %v1911_v0 = vrot.slane %v1903_v57, %v3132_v38  ;;  %v1927_v61 = vrot.slane %v1919_v58, %v3132_v38 }
 0x42e   : > { %v1937_v62 = vcombine.low %v1918_v59, %v1934_v60  ;;  %v1936_v63 = vcombine.high %v1911_v0, %v1927_v61  ;;  %v1935_v1 = vcombine.low %v1911_v0, %v1927_v61  ;;  %v1938_v32 = vcombine.high %v1918_v59, %v1934_v60 }
 0x430   : > { %1944 = vrot.lane.b32.xlu1 %v1937_v62, %s2828_s14  ;;  %1940 = vrot.lane.b32.xlu0 %v1936_v63, %s2829_s10 }
 0x434   : > { %1948 = vrot.lane.b32.xlu1 %v1938_v32, %s2830_s3 }
 0x4a2   : > { %v1945_v2 = vpop.permute.xlu1 %1944  ;;  %v1941_v3 = vpop.permute.xlu0 %1940 }
 0x4a3   : > { %v1951_v4 = vsel %vm774_vm2, %v1935_v1, %v1941_v3 }
 0x4a4   : > { %v1953_v5 = vsel %vm1952_vm3, %v1951_v4, %v1945_v2 }
 0x4a6   : > { %v1949_v38 = vpop.permute.xlu1 %1948 }
 0x4a7   : > { %v1955_v6 = vsel %vm1954_vm4, %v1953_v5, %v1949_v38 }
 0x4a8   : > { %2387 = vmatmul.mubr.msk.f32.vlgmr.msra.gmra.mxu0 %vm476_vm1, %v1955_v6 }
 0x568   : > { %v2036_v20 = vpop.f32.mrf.mxu0 }
 0x569   : > { %v2037_v8 = vadd.f32 %v2263_v7, %v2036_v20 }
 0x56a   : > { %v2388_v9 = vpop.f32.mrf.mxu0 }
 0x56b   : > { %2040 = vst [vmem:[%s466_s20] sm:$0xff] %v2037_v8 }
 0x56c   : > { %2731 = shalt.err (!%p2728_p4)
}
 0x56d   : > { %s2732_s9 = scalar_lea.hbm %s3262_s17, 128  ;;  %s2736_s25 = scalar_lea.hbm %s3312_s8, 256 }
 0x56e   : > { %p2733_p8 = scmp.ne.s32.totalorder %s3262_s17, %s2732_s9  ;;  %p2737_p0 = scmp.lt.s32.totalorder %s3262_s17, %s3312_s8 }
 0x56f   : > { %p2738_p13 = scmp.lt.s32.totalorder %s2736_s25, %s2732_s9 }
 0x570   : > { %p2734_p6 = pnand %p2733_p8, %p3360_p12 }
 0x571   : > { %p2739_p9 = por %p2738_p13, %p2737_p0 }
 0x572   : > { %p2735_p3 = pneg %p2734_p6 }
 0x574   : > { %p2740_p11 = pnand %p2739_p9, %p2735_p3 }
 0x576   : > { %2743 = shalt.err (!%p2740_p11)
}
 0x577   : > { %2411 = dma.vmem_to_hbm [thread:$0]  (%p3360_p12), %s2057_s13, 128, %s3262_s17, %s2042_s19  }
 0x578 PF: > { %s3361_s1 = sld [smem:[#allocation22_spill]] }
 0x579   : > { %s3362_s14 = sld [smem:[#allocation27_spill]] }
 0x57a   : > { %s3363_s10 = sld [smem:[#allocation24_spill]] }
 0x57e   : > { %s2068_s3 = sand.u32 1, %s3361_s1  }
 0x57f   : > { %p3364_p2 = scmp.ne.s32.totalorder %s3362_s14, 0  ;;  %s2069_s23 = scalar_lea.sflag [#allocation6], %s2068_s3 }
 0x580   : > { %p3365_p5 = scmp.ge.s32.totalorder %s3363_s10, 2 }
 0x582   : > { %p2437_p10 = pnand %p3365_p5, %p3364_p2 }
 0x584   : > { %p2438_p1 = pneg %p2437_p10 }
 0x586   : > { %2785 = dma.done.wait (%p2438_p1), %s2069_s23, 128  }
 0x587   : > { %2787 = vsyncadd (%p2438_p1), %s2069_s23, 4294967168  ;;  %s29_s10 = sadd.s32 1, %s3363_s10   ;;  %s3366_s21 = sld [smem:[#allocation26_spill]] }
 0x588   : > { %p26_p7 = scmp.ge.s32.totalorder %s29_s10, 4   ;;  %s3367_s30 = sld [smem:[#allocation23_spill]] }
 0x589   : > { %s3368_s9 = sld [smem:[#allocation25_spill]]  ;;  %s3369_s27 = smov %s2794_s28 }
 0x58a   : > { %s3370_s28 = smov %s2798_s29  ;;  %28 = sbr.rel (!%p26_p7) target bundleno = 15 (0xf), region = 141 }
 0x58d   : > { %s3371_s29 = smov %s3366_s21 }
 0x58f   :  { %2074 = vsyncpa [#allocation5], 1 }
 0x590   :  { %2076 = vsyncpa [#allocation5 + $0x1], 1 }
 0x591   :  { %2077 = vsyncpa [#allocation8], 1 }
 0x592   :  { %2079 = vsyncpa [#allocation8 + $0x1], 1 }
 0x593   :  { %2080 = vsyncpa [#allocation11], 1 }
 0x594   :  { %2081 = vsyncpa [#allocation14], 1 }
 0x595   :  { %2082 = vsyncpa [#allocation6], 1 }
 0x596   :  { %2084 = vsyncpa [#allocation6 + $0x1], 1 }

// kernel: tpu_custom_call.1
= control target key start
LH: loop header
LB: loop body
LE: loop exit
PB: predicated region body
PF: predicated region fallthrough
CT: control target
= control target key end

     0   :  { %s3304_s0 = inlined_call_operand.hbm [shape: f32[2,8,32], index: 0, kind: input, shape index: {}]   ;;  %s3305_s1 = inlined_call_operand.hbm [shape: f32[2,8,32], index: 1, kind: input, shape index: {}]   ;;  %s3306_s2 = inlined_call_operand.hbm [shape: f32[2,8,32], index: 2, kind: input, shape index: {}]   ;;  %s3307_s3 = inlined_call_operand.hbm [shape: f32[32,32], index: 3, kind: input, shape index: {}]   ;;  %s3308_s4 = inlined_call_operand.hbm [shape: f32[32,32], index: 4, kind: input, shape index: {}]   ;;  %s3309_s5 = inlined_call_operand.hbm [shape: f32[32,32], index: 5, kind: input, shape index: {}]   ;;  %s3310_s6 = inlined_call_operand.hbm [shape: f32[32,128], index: 6, kind: input, shape index: {}]   ;;  %s3311_s7 = inlined_call_operand.vmem [shape: f32[1,128], index: 7, kind: input, shape index: {}]   ;;  %s3312_s8 = inlined_call_operand.hbm [shape: f32[2,8,128], index: 8, kind: output, shape index: {}]  }
   0x1   :  { %3328 = sst [smem:[#allocation28_spill]] %s3305_s1 }
   0x2   :  { %3329 = sst [smem:[#allocation29_spill]] %s3307_s3 }
   0x3   :  { %3330 = sst [smem:[#allocation30_spill]] %s3308_s4 }
   0x4   :  { %3331 = sst [smem:[#allocation31_spill]] %s3309_s5 }
   0x5   :  { %13 = vsyncpa [#allocation5], 0 }
   0x6   :  { %15 = vsyncpa [#allocation5 + $0x1], 0 }
   0x7   :  { %16 = vsyncpa [#allocation8], 0 }
   0x8   :  { %18 = vsyncpa [#allocation8 + $0x1], 0 }
   0x9   :  { %19 = vsyncpa [#allocation11], 0 }
   0xa   :  { %20 = vsyncpa [#allocation14], 0 }
   0xb   :  { %21 = vsyncpa [#allocation6], 0 }
   0xc   :  { %23 = vsyncpa [#allocation6 + $0x1], 0  ;;  %s2877_s27 = smov 0   ;;  %s2879_s28 = smov 0  }
   0xd   :  { %s2881_s29 = smov 0   ;;  %s2883_s30 = smov 0  }
   0xe   :  { %s2885_s9 = smov 0   ;;  %s2887_s10 = smov 0  }
   0xf LB: > { %3332 = sst [smem:[#allocation22_spill]] %s2790_s27  ;;  %s2908_s11 = sadd.s32 4294967295, %s2810_s10   ;;  %s2810_s10 = sphi %s2887_s10, %s29_s10   ;;  %s2806_s9 = sphi %s2885_s9, %s3368_s9   ;;  %s2802_s30 = sphi %s2883_s30, %s3367_s30   ;;  %s2798_s29 = sphi %s2881_s29, %s3371_s29   ;;  %s2794_s28 = sphi %s2879_s28, %s3370_s28   ;;  %s2790_s27 = sphi %s2877_s27, %s3369_s27  }
  0x10   : > { %3333 = sst [smem:[#allocation23_spill]] %s2806_s9  ;;  %p2219_p0 = scmp.ge.s32.totalorder %s2810_s10, 1 }
  0x11   : > { %3334 = sst [smem:[#allocation24_spill]] %s2810_s10  ;;  %p3322_p1 = scmp.eq.s32.totalorder %s2908_s11, 0 }
  0x12   : > { %p259_p2 = scmp.lt.s32.totalorder %s2810_s10, 3  ;;  %s2812_s13 = smov [#allocation10]  }
  0x13   : > { %s271_s14 = sshll.u32 %s2812_s13, 4  ;;  %s2813_s16 = smov [#allocation13]   ;;  %s272_s14 = int_to_ptr.vmem [resolvable:$true] %s271_s14 }
  0x14   : > { %p2913_p3 = pnand %p2219_p0, %p259_p2  ;;  %s297_s17 = sshll.u32 %s2813_s16, 4  ;;  %s298_s17 = int_to_ptr.vmem [resolvable:$true] %s297_s17 }
  0x15   : > { %s2541_s18 = scalar_lea.vmem %s272_s14, 512  ;;  %p2549_p11 = scmp.lt.s32.totalorder %s272_s14, %s272_s14 }
  0x16   : > { %p2413_p4 = pneg %p2913_p3  ;;  %p2542_p8 = scmp.ne.s32.totalorder %s272_s14, %s2541_s18 }
  0x17   : > { %p2550_p12 = scmp.lt.s32.totalorder %s2541_s18, %s2541_s18 }
  0x18   : > { %p2922_p6 = pnand %p2413_p4, %p3322_p1 }
  0x19   : > { %p2551_p13 = por %p2550_p12, %p2549_p11 }
  0x1a   : > { %p3323_p7 = pneg %p2922_p6 }
  0x1c   : > { %p2544_p9 = pnand %p2542_p8, %p3323_p7 }
  0x1e   : > { %p2545_p10 = pneg %p2544_p9 }
  0x20   : > { %p2552_p0 = pnand %p2551_p13, %p2545_p10 }
  0x22   : > { %2555 = shalt.err (!%p2552_p0)
}
  0x23   : > { %s3313_s19 = smov 128   ;;  %s3315_s20 = smov 8  }
  0x24   : > { %s3337_s3 = sld [smem:[#allocation29_spill]]  ;;  %s2567_s23 = scalar_lea.vmem %s298_s17, 512 }
  0x25   : > { %p2568_p2 = scmp.ne.s32.totalorder %s298_s17, %s2567_s23  ;;  %p2575_p9 = scmp.lt.s32.totalorder %s298_s17, %s298_s17 }
  0x26   : > { %p2576_p10 = scmp.lt.s32.totalorder %s2567_s23, %s2567_s23 }
  0x27   : > { %p2570_p4 = pnand %p2568_p2, %p3323_p7 }
  0x28   : > { %p2577_p11 = por %p2576_p10, %p2575_p9 }
  0x29   : > { %p2571_p8 = pneg %p2570_p4 }
  0x2a   : > { %2416 = dma.hbm_to_vmem [thread:$0]  (!%p2922_p6), %s3337_s3, 512, %s272_s14, [#allocation11], %s3313_s19, %s3313_s19, %s3315_s20  }
  0x2b   : > { %p2578_p12 = pnand %p2577_p11, %p2571_p8 }
  0x2d   : > { %2581 = shalt.err (!%p2578_p12)
}
  0x2e   : > { %s3338_s5 = sld [smem:[#allocation31_spill]]  ;;  %s2218_s26 = sadd.s32 4294967294, %s2810_s10  }
  0x2f   : > { %s41_s13 = sadd.s32 1, %s2806_s9  ;;  %s50_s14 = sadd.s32 1, %s2798_s29 }
  0x30   : > { %p43_p13 = scmp.ge.s32.totalorder %s41_s13, 2  ;;  %p57_p0 = scmp.ne.s32.totalorder %s2798_s29, %s2794_s28 }
  0x31   : > { %p58_p2 = scmp.eq.s32.totalorder %s2810_s10, 0  ;;  %p63_p8 = scmp.ne.s32.totalorder %s2794_s28, %s2790_s27 }
  0x32   : > { %s3373_s13 = smov (%p43_p13, %s41_s13), 0  ;;  %p246_p9 = scmp.eq.s32.totalorder %s2908_s11, 1 }
  0x33   : > { %3339 = sst [smem:[#allocation25_spill]] %s3373_s13  ;;  %p2958_p4 = por %p58_p2, %p57_p0 }
  0x34   : > { %2422 = dma.hbm_to_vmem [thread:$0]  (!%p2922_p6), %s3338_s5, 512, %s298_s17, [#allocation14], %s3313_s19, %s3313_s19, %s3315_s20  }
  0x35   : > { %s45_s17 = ssub.s32 %s2806_s9, %s3373_s13  ;;  %p2969_p11 = por %p3322_p1, %p63_p8 }
  0x36   : > { %p48_p10 = scmp.eq.s32.totalorder %s45_s17, 0  ;;  %p2973_p12 = por %p246_p9, %p57_p0 }
  0x37   : > { %p252_p13 = scmp.eq.s32.totalorder %s2218_s26, 1  ;;  %p2444_p5 = scmp.lt.s32.totalorder %s2810_s10, 2 }
  0x38   : > { %s3342_s21 = scalar_select %p2973_p12, 1, 0 }
  0x39   : > { %s2978_s22 = scalar_select %p48_p10, %s2798_s29, %s50_s14  }
  0x3a   : > { %p2980_p2 = por %p252_p13, %p63_p8  ;;  %s3319_s24 = sand.u32 1, %s2798_s29  }
  0x3b   : > { %3343 = sst [smem:[#allocation26_spill]] %s2978_s22  ;;  %s2987_s25 = sshll.u32 %s2806_s9, 7 }
  0x3c   : > { %s3344_s23 = scalar_select %p2980_p2, 1, 0 }
  0x3d   : > { %s2991_s17 = sshll.u32 %s3319_s24, 3  ;;  %p2995_p0 = pnand %p2444_p5, %p2958_p4 }
  0x3e   : > { %3345 = sst [smem:[#allocation27_spill]] %s3344_s23  ;;  %s346_s26 = sand.u32 1, %s2810_s10  }
  0x3f   : > { %s3347_s1 = sld [smem:[#allocation28_spill]]  ;;  %s350_s5 = scalar_lea.vmem [#allocation7], %s2991_s17 }
  0x40   : > { %s357_s13 = sshll.u32 %s350_s5, 4  ;;  %s3005_s9 = scalar_lea.sflag [#allocation8], %s346_s26  ;;  %s358_s13 = int_to_ptr.vmem [resolvable:$true] %s357_s13 }
  0x41   : > { %p3324_p8 = pneg %p2995_p0  ;;  %s2595_s16 = scalar_lea.vmem %s358_s13, 128 }
  0x42   : > { %p2596_p9 = scmp.ne.s32.totalorder %s358_s13, %s2595_s16  ;;  %s2816_s24 = smov [#allocation7]  }
  0x43   : > { %s2600_s22 = sshll.u32 %s2816_s24, 4  ;;  %s2601_s22 = int_to_ptr.vmem [resolvable:$false] %s2600_s22 }
  0x44   : > { %p2598_p5 = pnand %p2596_p9, %p3324_p8  ;;  %s2602_s10 = scalar_lea.vmem %s2601_s22, 256 }
  0x45   : > { %s355_s3 = scalar_lea.hbm %s3347_s1, %s2987_s25  ;;  %p2603_p10 = scmp.lt.s32.totalorder %s358_s13, %s2601_s22 }
  0x46   : > { %p2599_p4 = pneg %p2598_p5  ;;  %p2604_p13 = scmp.lt.s32.totalorder %s2602_s10, %s2595_s16 }
  0x48   : > { %p2605_p1 = por %p2604_p13, %p2603_p10 }
  0x4a   : > { %p2606_p7 = pnand %p2605_p1, %p2599_p4 }
  0x4c   : > { %2609 = shalt.err (!%p2606_p7)
}
  0x4d   : > { %2432 = dma.hbm_to_vmem [thread:$0]  (!%p2995_p0), %s355_s3, 128, %s358_s13, %s3005_s9  }
  0x4e   : > { %s2817_s5 = smov [#allocation12]   ;;  %s2818_s26 = smov [#allocation15]  }
  0x4f   : > { %s284_s20 = sshll.u32 %s2817_s5, 4  ;;  %s310_s14 = sshll.u32 %s2818_s26, 4  ;;  %s285_s20 = int_to_ptr.vmem [resolvable:$true] %s284_s20  ;;  %s311_s14 = int_to_ptr.vmem [resolvable:$true] %s310_s14 }
  0x50   : > { %s2621_s1 = scalar_lea.vmem %s285_s20, 512  ;;  %p3348_p5 = pneg %p2922_p6 }
  0x51   : > { %p2622_p9 = scmp.ne.s32.totalorder %s285_s20, %s2621_s1  ;;  %p2629_p12 = scmp.lt.s32.totalorder %s285_s20, %s285_s20 }
  0x52   : > { %p2630_p10 = scmp.lt.s32.totalorder %s2621_s1, %s2621_s1 }
  0x53   : > { %p2624_p8 = pnand %p2622_p9, %p3348_p5 }
  0x54   : > { %p2631_p1 = por %p2630_p10, %p2629_p12 }
  0x55   : > { %p2625_p2 = pneg %p2624_p8 }
  0x57   : > { %p2632_p7 = pnand %p2631_p1, %p2625_p2 }
  0x59   : > { %2635 = shalt.err (!%p2632_p7)
}
  0x5a   : > { %s3349_s10 = smov 8   ;;  %s3350_s3 = smov 128  }
  0x5b   : > { %s3351_s4 = sld [smem:[#allocation30_spill]]  ;;  %s2647_s24 = scalar_lea.vmem %s311_s14, 512 }
  0x5c   : > { %p2648_p4 = scmp.ne.s32.totalorder %s311_s14, %s2647_s24  ;;  %p3352_p8 = pmov %p3348_p5 }
  0x5d   : > { %p2655_p12 = scmp.lt.s32.totalorder %s311_s14, %s311_s14  ;;  %p2656_p2 = scmp.lt.s32.totalorder %s2647_s24, %s2647_s24 }
  0x5e   : > { %p2650_p13 = pnand %p2648_p4, %p3352_p8 }
  0x5f   : > { %p2657_p5 = por %p2656_p2, %p2655_p12 }
  0x60   : > { %p2651_p9 = pneg %p2650_p13 }
  0x61   : > { %2419 = dma.hbm_to_vmem [thread:$0]  (!%p2922_p6), %s3351_s4, 512, %s285_s20, [#allocation11], %s3350_s3, %s3350_s3, %s3349_s10  }
  0x62   : > { %p2658_p10 = pnand %p2657_p5, %p2651_p9 }
  0x64   : > { %2661 = shalt.err (!%p2658_p10)
}
  0x65   : > { %2425 = dma.hbm_to_vmem [thread:$0]  (!%p2922_p6), %s3310_s6, 512, %s311_s14, [#allocation14], %s3350_s3, %s3350_s3, %s3349_s10  }
  0x66   : > { %s337_s26 = scalar_lea.hbm %s3304_s0, %s2987_s25  ;;  %s331_s13 = scalar_lea.vmem [#allocation4], %s2991_s17 }
  0x67   : > { %s339_s22 = sshll.u32 %s331_s13, 4  ;;  %s373_s4 = scalar_lea.hbm %s3306_s2, %s2987_s25  ;;  %s340_s22 = int_to_ptr.vmem [resolvable:$true] %s339_s22 }
  0x68   : > { %s3353_s23 = sand.u32 1, %s2798_s29   ;;  %s2675_s1 = scalar_lea.vmem %s340_s22, 128 }
  0x69   : > { %s328_s27 = scalar_lea.sflag [#allocation5], %s3353_s23  ;;  %p2676_p1 = scmp.ne.s32.totalorder %s340_s22, %s2675_s1 }
  0x6a   : > { %p3354_p7 = pneg %p2995_p0  ;;  %s2819_s14 = smov [#allocation4]  }
  0x6b   : > { %s2680_s10 = sshll.u32 %s2819_s14, 4  ;;  %s2681_s10 = int_to_ptr.vmem [resolvable:$false] %s2680_s10 }
  0x6c   : > { %p2678_p4 = pnand %p2676_p1, %p3354_p7  ;;  %s2682_s3 = scalar_lea.vmem %s2681_s10, 256 }
  0x6d   : > { %p2683_p6 = scmp.lt.s32.totalorder %s340_s22, %s2681_s10  ;;  %p2684_p13 = scmp.lt.s32.totalorder %s2682_s3, %s2675_s1 }
  0x6e   : > { %p2679_p8 = pneg %p2678_p4 }
  0x6f   : > { %p2685_p9 = por %p2684_p13, %p2683_p6 }
  0x71   : > { %p2686_p12 = pnand %p2685_p9, %p2679_p8 }
  0x73   : > { %2689 = shalt.err (!%p2686_p12)
}
  0x74   : > { %2429 = dma.hbm_to_vmem [thread:$0]  (!%p2995_p0), %s337_s26, 128, %s340_s22, %s328_s27  }
  0x75   : > { %s368_s23 = scalar_lea.vmem [#allocation9], %s2991_s17  ;;  %p3355_p5 = pmov %p3354_p7 }
  0x76   : > { %s375_s16 = sshll.u32 %s368_s23, 4  ;;  %s2820_s20 = smov [#allocation9]   ;;  %s376_s16 = int_to_ptr.vmem [resolvable:$true] %s375_s16 }
  0x77   : > { %s2703_s5 = scalar_lea.vmem %s376_s16, 128  ;;  %s2708_s13 = sshll.u32 %s2820_s20, 4  ;;  %s2709_s13 = int_to_ptr.vmem [resolvable:$false] %s2708_s13 }
  0x78   : > { %p2704_p2 = scmp.ne.s32.totalorder %s376_s16, %s2703_s5  ;;  %s2710_s15 = scalar_lea.vmem %s2709_s13, 256 }
  0x79   : > { %p2711_p7 = scmp.lt.s32.totalorder %s376_s16, %s2709_s13  ;;  %p2712_p4 = scmp.lt.s32.totalorder %s2710_s15, %s2703_s5 }
  0x7a   : > { %p2706_p10 = pnand %p2704_p2, %p3355_p5 }
  0x7b   : > { %p2713_p8 = por %p2712_p4, %p2711_p7 }
  0x7c   : > { %p2707_p1 = pneg %p2706_p10 }
  0x7e   : > { %p2714_p6 = pnand %p2713_p8, %p2707_p1 }
  0x80   : > { %2717 = shalt.err (!%p2714_p6)
}
  0x81   : > { %2435 = dma.hbm_to_vmem [thread:$0]  (!%p2995_p0), %s373_s4, 128, %s376_s16, %s3005_s9  }
  0x82   : > { %384 = sbr.rel (%p2913_p3) target bundleno = 1400 (0x578), region = 52  ;;  %s3068_s26 = sand.u32 (!%p2913_p3), 1, %s2794_s28  }
  0x83   : > { %s3071_s22 = sshll.u32 (!%p2913_p3), %s3068_s26, 3  ;;  %s387_s19 = scalar_lea.sflag (!%p2913_p3), [#allocation5], %s3068_s26 }
  0x84   : > { %s390_s24 = scalar_lea.vmem (!%p2913_p3), [#allocation4], %s3071_s22 }
  0x87   : > { %2769 = dma.done.wait (%p2969_p11), %s387_s19, 128  }
  0x88   : > { %2771 = vsyncadd (%p2969_p11), %s387_s19, 4294967168  ;;  %s395_s4 = sand.u32 1, %s2908_s11   ;;  %s399_s12 = scalar_lea.vmem [#allocation7], %s3071_s22 }
  0x89   : > { %s396_s9 = scalar_lea.sflag [#allocation8], %s395_s4 }
  0x8a   : > { %2773 = dma.done.wait (%p2969_p11), %s396_s9, 256  }
  0x8b   : > { %2775 = vsyncadd (%p2969_p11), %s396_s9, 4294967040  ;;  %s408_s25 = scalar_lea.vmem [#allocation9], %s3071_s22  ;;  %p3356_p3 = scmp.eq.s32.totalorder %s2908_s11, 0 }
  0x8d   : > { %2777 = dma.done.wait (%p3356_p3), [#allocation11], 1024   ;;  %p3357_p0 = pmov %p3356_p3 }
  0x8f   : > { %2779 = vsyncadd (%p3357_p0), [#allocation11], 4294966272  ;;  %p3358_p13 = pmov %p3357_p0 }
  0x90   : > { %p3359_p9 = pmov %p3357_p0 }
  0x91   : > { %2781 = dma.done.wait (%p3358_p13), [#allocation14], 1024  }
  0x92   : > { %2783 = vsyncadd (%p3359_p9), [#allocation14], 4294966272  ;;  %v2821_v0 = vmov 0.0   ;;  %vm2822_vm0 = vmmov 0   ;;  %v475_v1 = vld [vmem:[#allocation12 + $0x18] sm:$0xff]  ;;  %v474_v2 = vld [vmem:[#allocation12 + $0x10] sm:$0xff]  ;;  %v643_v24 = vlaneseq }
  0x93   : > { %2305 = vmatprep.subr.mxu0 %v2821_v0  ;;  %2313 = vmatprep.mubr.msk.f32.mxu0 %vm2822_vm0, %v2821_v0  ;;  %v473_v3 = vld [vmem:[#allocation12 + $0x8] sm:$0xff]  ;;  %v554_v4 = vld [vmem:[#allocation13 + $0x18] sm:$0xff]  ;;  %v553_v5 = vld [vmem:[#allocation13 + $0x10] sm:$0xff]  ;;  %vm476_vm1 = vcmask 261120   ;;  %s2823_s11 = smov 104   ;;  %s2824_s18 = smov 120  }
  0x94   : > { %2316 = vmatprep.subr.mxu1 %v2821_v0  ;;  %2324 = vmatprep.mubr.msk.f32.mxu1 %vm2822_vm0, %v2821_v0  ;;  %v472_v6 = vld [vmem:[#allocation12] sm:$0xff]  ;;  %v933_v8 = vld [vmem:[#allocation10 + $0x18] sm:$0xff]  ;;  %v932_v9 = vld [vmem:[#allocation10 + $0x10] sm:$0xff]  ;;  %s2825_s1 = smov 112   ;;  %v2826_v22 = vmov 1983009808  }
  0x95   : > { %2306 = vmatpush3.msra.mxu0 %v475_v1  ;;  %2317 = vmatpush3.msra.mxu1 %v554_v4  ;;  %v471_v7 = vld [vmem:[%s399_s12] sm:$0xff]  ;;  %v929_v12 = vld [vmem:[%s390_s24] sm:$0xff]  ;;  %v641_v23 = vunpack.c.l.s4 %v2826_v22  ;;  %v2827_v25 = vmov 1934713408   ;;  %v644_v28 = vshrl.u32 %v643_v24, 7  ;;  %vm774_vm2 = vcmask 64512  }
  0x96   : > { %2307 = vmatprep.subr.mxu0 %v2821_v0  ;;  %2318 = vmatprep.subr.mxu1 %v2821_v0  ;;  %v931_v10 = vld [vmem:[#allocation10 + $0x8] sm:$0xff]  ;;  %v930_v11 = vld [vmem:[#allocation10] sm:$0xff]  ;;  %v550_v15 = vld [vmem:[%s408_s25] sm:$0xff]  ;;  %v673_v26 = vunpack.c.l.s4 %v2827_v25  ;;  %s2828_s14 = smov 16   ;;  %s2829_s10 = smov 8   ;;  %vm1952_vm3 = vcmask 130048  }
  0x97   : > { %2308 = vmatpush3.msra.mxu0 %v474_v2  ;;  %2319 = vmatpush3.msra.mxu1 %v553_v5  ;;  %v552_v13 = vld [vmem:[#allocation13 + $0x8] sm:$0xff]  ;;  %v551_v14 = vld [vmem:[#allocation13] sm:$0xff]  ;;  %v642_v27 = vunpack.c.0.s8 %v641_v23  ;;  %s2830_s3 = smov 24   ;;  %vm1954_vm4 = vcmask 195584   ;;  %s2266_s5 = sshll.u32 %s2802_s30, 7 }
  0x98   : > { %2309 = vmatprep.subr.mxu0 %v2821_v0  ;;  %2320 = vmatprep.subr.mxu1 %v2821_v0  ;;  %v674_v31 = vunpack.c.0.s8 %v673_v26  ;;  %s466_s20 = scalar_lea.vmem [#allocation16], %s3071_s22  ;;  %s3262_s17 = scalar_lea.hbm %s3312_s8, %s2266_s5 }
  0x99   : > { %2310 = vmatpush3.msra.mxu0 %v473_v3  ;;  %2321 = vmatpush3.msra.mxu1 %v552_v13  ;;  %v3130_v32 = vsub.s32 %v642_v27, %v644_v28  ;;  %s2056_s13 = sshll.u32 %s466_s20, 4  ;;  %s2042_s19 = scalar_lea.sflag [#allocation6], %s3068_s26  ;;  %s2057_s13 = int_to_ptr.vmem [resolvable:$true] %s2056_s13 }
  0x9a   : > { %2311 = vmatprep.subr.mxu0 %v2821_v0  ;;  %2322 = vmatprep.subr.mxu1 %v2821_v0  ;;  %v3132_v38 = vsub.s32 %v674_v31, %v644_v28  ;;  %s2718_s24 = scalar_lea.vmem %s2057_s13, 128  ;;  %p3360_p12 = scmp.ne.s32.totalorder %s3342_s21, 0 }
  0x9b   : > { %2312 = vmatpush3.msra.mxu0 %v472_v6  ;;  %2323 = vmatpush3.msra.mxu1 %v551_v14  ;;  %p2719_p11 = scmp.ne.s32.totalorder %s2057_s13, %s2718_s24  ;;  %s2831_s4 = smov [#allocation16]  }
  0x9c   : > { %2314 = vmatmul.mubr.msk.f32.vlgmr.msra.gmra.mxu0 %vm476_vm1, %v471_v7  ;;  %2327 = vmatprep.subr.mxu0 %v2821_v0  ;;  %s2722_s30 = sshll.u32 %s2831_s4, 4  ;;  %s2723_s30 = int_to_ptr.vmem [resolvable:$false] %s2722_s30 }
  0x9d   : > { %2328 = vmatpush3.msra.mxu0 %v933_v8  ;;  %2335 = vmatprep.mubr.msk.f32.mxu0 %vm2822_vm0, %v2821_v0  ;;  %p2720_p2 = pnand %p2719_p11, %p3360_p12  ;;  %s2724_s22 = scalar_lea.vmem %s2723_s30, 256 }
  0x9e   : > { %2329 = vmatprep.subr.mxu0 %v2821_v0  ;;  %2325 = vmatmul.mubr.msk.f32.vlgmr.msra.gmra.mxu1 %vm476_vm1, %v550_v15  ;;  %p2725_p10 = scmp.lt.s32.totalorder %s2057_s13, %s2723_s30  ;;  %p2726_p1 = scmp.lt.s32.totalorder %s2724_s22, %s2718_s24 }
  0x9f   : > { %2330 = vmatpush3.msra.mxu0 %v932_v9  ;;  %2338 = vmatprep.subr.mxu1 %v2821_v0  ;;  %p2721_p5 = pneg %p2720_p2 }
  0xa0   : > { %2331 = vmatprep.subr.mxu0 %v2821_v0  ;;  %2340 = vmatprep.mubr.msk.f32.mxu1 %vm2822_vm0, %v2821_v0  ;;  %p2727_p7 = por %p2726_p1, %p2725_p10 }
  0xa1   : > { %2332 = vmatpush3.msra.mxu0 %v931_v10 }
  0xa2   : > { %2333 = vmatprep.subr.mxu0 %v2821_v0  ;;  %p2728_p4 = pnand %p2727_p7, %p2721_p5 }
  0xa3   : > { %2334 = vmatpush3.msra.mxu0 %v930_v11 }
  0xa4   : > { %2336 = vmatmul.mubr.msk.f32.vlgmr.msra.gmra.mxu0 %vm476_vm1, %v929_v12  ;;  %2358 = vmatprep.subr.mxu0 %v2821_v0 }
  0xa5   : > { %2360 = vmatprep.mubr.msk.f32.mxu0 %vm2822_vm0, %v2821_v0 }
 0x15c   : > { %v546_v16 = vpop.f32.mrf.mxu0 }
 0x15d   : > { %635 = vrot.lane.b32.xlu1 %v546_v16, %s2823_s11  ;;  %629 = vrot.lane.b32.xlu0 %v546_v16, %s2824_s18 }
 0x15e   : > { %v2315_v17 = vpop.f32.mrf.mxu0  ;;  %v3125_v20 = vpop.f32.mrf.mxu1 }
 0x160   : > { %v2326_v21 = vpop.f32.mrf.mxu1 }
 0x161   : > { %632 = vrot.lane.b32.xlu0 %v546_v16, %s2825_s1 }
 0x164   : > { %v1004_v18 = vpop.f32.mrf.mxu0 }
 0x165   : > { %1012 = vrot.lane.b32.xlu0 %v1004_v18, %s2825_s1  ;;  %1009 = vrot.lane.b32.xlu1 %v1004_v18, %s2824_s18 }
 0x166   : > { %v2337_v19 = vpop.f32.mrf.mxu0 }
 0x169   : > { %1015 = vrot.lane.b32.xlu1 %v1004_v18, %s2823_s11  ;;  %780 = vrot.lane.b32.xlu0 %v3125_v20, %s2824_s18 }
 0x16d   : > { %783 = vrot.lane.b32.xlu1 %v3125_v20, %s2825_s1  ;;  %786 = vrot.lane.b32.xlu0 %v3125_v20, %s2823_s11 }
 0x1cf   : > { %v636_v29 = vpop.permute.xlu1 %635  ;;  %v630_v30 = vpop.permute.xlu0 %629 }
 0x1d0   : > { %v654_v33 = vcombine.low %v630_v30, %v636_v29  ;;  %v655_v34 = vcombine.high %v630_v30, %v636_v29 }
 0x1d2   : > { %v662_v39 = vrot.slane %v654_v33, %v3130_v32  ;;  %v669_v40 = vrot.slane %v655_v34, %v3130_v32 }
 0x1d3   : > { %v633_v35 = vpop.permute.xlu0 %632 }
 0x1d4   : > { %v638_v36 = vcombine.low %v546_v16, %v633_v35  ;;  %v639_v37 = vcombine.high %v546_v16, %v633_v35 }
 0x1d6   : > { %v646_v41 = vrot.slane %v638_v36, %v3130_v32  ;;  %v653_v42 = vrot.slane %v639_v37, %v3130_v32 }
 0x1d7   : > { %v1010_v43 = vpop.permute.xlu1 %1009  ;;  %v1013_v48 = vpop.permute.xlu0 %1012 }
 0x1d8   : > { %v670_v44 = vcombine.low %v646_v41, %v662_v39  ;;  %v671_v45 = vcombine.high %v646_v41, %v662_v39  ;;  %v686_v46 = vcombine.low %v653_v42, %v669_v40  ;;  %v687_v47 = vcombine.high %v653_v42, %v669_v40 }
 0x1d9   : > { %v1018_v53 = vcombine.low %v1004_v18, %v1013_v48  ;;  %v1019_v54 = vcombine.high %v1004_v18, %v1013_v48 }
 0x1da   : > { %v678_v49 = vrot.slane %v670_v44, %v3132_v38  ;;  %v685_v50 = vrot.slane %v671_v45, %v3132_v38  ;;  %v694_v51 = vrot.slane %v686_v46, %v3132_v38  ;;  %v701_v52 = vrot.slane %v687_v47, %v3132_v38 }
 0x1db   : > { %v1016_v55 = vpop.permute.xlu1 %1015  ;;  %v1026_v3 = vrot.slane %v1018_v53, %v3130_v32  ;;  %v1033_v4 = vrot.slane %v1019_v54, %v3130_v32  ;;  %v781_v54 = vpop.permute.xlu0 %780 }
 0x1dc   : > { %v706_v56 = vcombine.low %v678_v49, %v685_v50  ;;  %v2242_v57 = vcombine.high %v678_v49, %v685_v50  ;;  %v722_v58 = vcombine.low %v694_v51, %v701_v52  ;;  %v2243_v59 = vcombine.high %v694_v51, %v701_v52 }
 0x1dd   : > { %v1034_v60 = vcombine.low %v1010_v43, %v1016_v55  ;;  %v1035_v61 = vcombine.high %v1010_v43, %v1016_v55 }
 0x1de   : > { %v713_v62 = vrot.slane %v706_v56, %v3130_v32  ;;  %v721_v63 = vrot.slane %v2242_v57, %v3130_v32  ;;  %v729_v1 = vrot.slane %v722_v58, %v3130_v32  ;;  %v737_v2 = vrot.slane %v2243_v59, %v3130_v32 }
 0x1df   : > { %v1042_v5 = vrot.slane %v1034_v60, %v3130_v32  ;;  %v1049_v6 = vrot.slane %v1035_v61, %v3130_v32  ;;  %v784_v55 = vpop.permute.xlu1 %783  ;;  %v787_v58 = vpop.permute.xlu0 %786 }
 0x1e0   : > { %v738_v7 = vcombine.low %v713_v62, %v721_v63  ;;  %v739_v8 = vcombine.high %v713_v62, %v721_v63  ;;  %v754_v9 = vcombine.low %v729_v1, %v737_v2  ;;  %v755_v10 = vcombine.high %v729_v1, %v737_v2 }
 0x1e1   : > { %v1050_v11 = vcombine.low %v1026_v3, %v1042_v5  ;;  %v1051_v12 = vcombine.high %v1026_v3, %v1042_v5  ;;  %v1066_v13 = vcombine.low %v1033_v4, %v1049_v6  ;;  %v1067_v14 = vcombine.high %v1033_v4, %v1049_v6 }
 0x1e2   : > { %v746_v15 = vrot.slane %v738_v7, %v3132_v38  ;;  %v753_v16 = vrot.slane %v739_v8, %v3132_v38  ;;  %v762_v17 = vrot.slane %v754_v9, %v3132_v38  ;;  %v769_v18 = vrot.slane %v755_v10, %v3132_v38 }
 0x1e3   : > { %v1058_v19 = vrot.slane %v1050_v11, %v3132_v38  ;;  %v1065_v21 = vrot.slane %v1051_v12, %v3132_v38  ;;  %v1074_v22 = vrot.slane %v1066_v13, %v3132_v38  ;;  %v1081_v23 = vrot.slane %v1067_v14, %v3132_v38 }
 0x1e4   : > { %v770_v24 = vcombine.low %v746_v15, %v762_v17  ;;  %v771_v25 = vcombine.high %v746_v15, %v762_v17  ;;  %v772_v26 = vcombine.low %v753_v16, %v769_v18  ;;  %v773_v27 = vcombine.high %v753_v16, %v769_v18 }
 0x1e5   : > { %v1086_v28 = vcombine.low %v1058_v19, %v1065_v21  ;;  %v2247_v29 = vcombine.high %v1058_v19, %v1065_v21  ;;  %v1102_v30 = vcombine.low %v1074_v22, %v1081_v23  ;;  %v2248_v31 = vcombine.high %v1074_v22, %v1081_v23 }
 0x1e6   : > { %775 = vst.msk [vmem:[#allocation2] sm:$0xff] %vm774_vm2, %v770_v24  ;;  %776 = vst.msk [vmem:[#allocation2 + $0x8] sm:$0xff] %vm774_vm2, %v771_v25  ;;  %v789_v56 = vcombine.low %v3125_v20, %v784_v55  ;;  %v790_v57 = vcombine.high %v3125_v20, %v784_v55  ;;  %v805_v59 = vcombine.low %v781_v54, %v787_v58 }
 0x1e7   : > { %777 = vst.msk [vmem:[#allocation2 + $0x10] sm:$0xff] %vm774_vm2, %v772_v26  ;;  %778 = vst.msk [vmem:[#allocation2 + $0x18] sm:$0xff] %vm774_vm2, %v773_v27  ;;  %v1093_v33 = vrot.slane %v1086_v28, %v3130_v32  ;;  %v1101_v34 = vrot.slane %v2247_v29, %v3130_v32  ;;  %v1109_v35 = vrot.slane %v1102_v30, %v3130_v32 }
 0x1e8   : > { %v1117_v36 = vrot.slane %v2248_v31, %v3130_v32  ;;  %v806_v60 = vcombine.high %v781_v54, %v787_v58  ;;  %v797_v61 = vrot.slane %v789_v56, %v3130_v32  ;;  %v804_v62 = vrot.slane %v790_v57, %v3130_v32 }
 0x1e9   : > { %v1118_v37 = vcombine.low %v1093_v33, %v1101_v34  ;;  %v1119_v43 = vcombine.high %v1093_v33, %v1101_v34  ;;  %v813_v63 = vrot.slane %v805_v59, %v3130_v32 }
 0x1ea   : > { %v1134_v39 = vcombine.low %v1109_v35, %v1117_v36  ;;  %v1135_v44 = vcombine.high %v1109_v35, %v1117_v36  ;;  %v820_v1 = vrot.slane %v806_v60, %v3130_v32 }
 0x1eb   : > { %v1126_v40 = vrot.slane %v1118_v37, %v3132_v38  ;;  %v1133_v48 = vrot.slane %v1119_v43, %v3132_v38  ;;  %v821_v2 = vcombine.low %v797_v61, %v813_v63  ;;  %v822_v3 = vcombine.high %v797_v61, %v813_v63 }
 0x1ec   : > { %v1142_v41 = vrot.slane %v1134_v39, %v3132_v38  ;;  %v1149_v49 = vrot.slane %v1135_v44, %v3132_v38  ;;  %v837_v4 = vcombine.low %v804_v62, %v820_v1  ;;  %v838_v5 = vcombine.high %v804_v62, %v820_v1 }
 0x1ed   : > { %v1154_v42 = vld [vmem:[#allocation2] sm:$0xff]  ;;  %v1155_v46 = vld [vmem:[#allocation2 + $0x8] sm:$0xff]  ;;  %v829_v6 = vrot.slane %v821_v2, %v3132_v38  ;;  %v836_v7 = vrot.slane %v822_v3, %v3132_v38 }
 0x1ee   : > { %2339 = vmatpush3.xpose.msk.msra.mxu1 %vm774_vm2, %v1154_v42  ;;  %v1150_v45 = vcombine.low %v1126_v40, %v1142_v41  ;;  %v1151_v47 = vcombine.high %v1126_v40, %v1142_v41  ;;  %v1156_v50 = vld [vmem:[#allocation2 + $0x10] sm:$0xff]  ;;  %v1152_v51 = vcombine.low %v1133_v48, %v1149_v49  ;;  %v1157_v52 = vld [vmem:[#allocation2 + $0x18] sm:$0xff]  ;;  %v1153_v53 = vcombine.high %v1133_v48, %v1149_v49 }
 0x1ef   : > { %2343 = vmatprep.subr.mxu1 %v2821_v0  ;;  %v845_v20 = vrot.slane %v837_v4, %v3132_v38  ;;  %v852_v8 = vrot.slane %v838_v5, %v3132_v38  ;;  %v857_v9 = vcombine.low %v829_v6, %v836_v7  ;;  %v2244_v10 = vcombine.high %v829_v6, %v836_v7  ;;  %v1959_v5 = vld [vmem:[#allocation15 + $0x18] sm:$0xff] }
 0x1f1   : > { %2341 = vmatmul.mubr.msk.f32.vlgmr.msra.gmra.mxu1 %vm774_vm2, %v1150_v45  ;;  %v873_v11 = vcombine.low %v845_v20, %v852_v8  ;;  %v2245_v12 = vcombine.high %v845_v20, %v852_v8  ;;  %v864_v13 = vrot.slane %v857_v9, %v3130_v32  ;;  %v872_v14 = vrot.slane %v2244_v10, %v3130_v32 }
 0x1f2   : > { %2344 = vmatpush3.xpose.msk.msra.mxu1 %vm774_vm2, %v1155_v46  ;;  %2345 = vmatprep.mubr.msk.f32.mxu1 %vm2822_vm0, %v2821_v0 }
 0x1f3   : > { %2348 = vmatprep.subr.mxu1 %v2821_v0  ;;  %v880_v15 = vrot.slane %v873_v11, %v3130_v32  ;;  %v888_v16 = vrot.slane %v2245_v12, %v3130_v32  ;;  %v889_v17 = vcombine.low %v864_v13, %v872_v14  ;;  %v890_v18 = vcombine.high %v864_v13, %v872_v14 }
 0x1f5   : > { %2346 = vmatmul.mubr.msk.f32.vlgmr.msra.gmra.mxu1 %vm774_vm2, %v1151_v47  ;;  %v905_v19 = vcombine.low %v880_v15, %v888_v16  ;;  %v906_v21 = vcombine.high %v880_v15, %v888_v16  ;;  %v897_v22 = vrot.slane %v889_v17, %v3132_v38  ;;  %v904_v23 = vrot.slane %v890_v18, %v3132_v38 }
 0x1f6   : > { %2349 = vmatpush3.xpose.msk.msra.mxu1 %vm774_vm2, %v1156_v50  ;;  %2350 = vmatprep.mubr.msk.f32.mxu1 %vm2822_vm0, %v2821_v0 }
 0x1f7   : > { %2353 = vmatprep.subr.mxu1 %v2821_v0  ;;  %v913_v24 = vrot.slane %v905_v19, %v3132_v38  ;;  %v920_v25 = vrot.slane %v906_v21, %v3132_v38 }
 0x1f9   : > { %2351 = vmatmul.mubr.msk.f32.vlgmr.msra.gmra.mxu1 %vm774_vm2, %v1152_v51  ;;  %v921_v26 = vcombine.low %v897_v22, %v913_v24  ;;  %v922_v27 = vcombine.high %v897_v22, %v913_v24  ;;  %v923_v28 = vcombine.low %v904_v23, %v920_v25  ;;  %v924_v29 = vcombine.high %v904_v23, %v920_v25 }
 0x1fa   : > { %2354 = vmatpush3.xpose.msk.msra.mxu1 %vm774_vm2, %v1157_v52  ;;  %2355 = vmatprep.mubr.msk.f32.mxu1 %vm2822_vm0, %v2821_v0 }
 0x1fb   : > { %2363 = vmatprep.subr.mxu1 %v2821_v0  ;;  %925 = vst.msk [vmem:[#allocation3] sm:$0xff] %vm774_vm2, %v921_v26  ;;  %926 = vst.msk [vmem:[#allocation3 + $0x8] sm:$0xff] %vm774_vm2, %v922_v27 }
 0x1fc   : > { %927 = vst.msk [vmem:[#allocation3 + $0x10] sm:$0xff] %vm774_vm2, %v923_v28  ;;  %928 = vst.msk [vmem:[#allocation3 + $0x18] sm:$0xff] %vm774_vm2, %v924_v29 }
 0x1fd   : > { %2356 = vmatmul.mubr.msk.f32.vlgmr.msra.gmra.mxu1 %vm774_vm2, %v1153_v53 }
 0x1fe   : > { %2365 = vmatprep.mubr.msk.f32.mxu1 %vm2822_vm0, %v2821_v0 }
 0x202   : > { %v1503_v30 = vld [vmem:[#allocation3] sm:$0xff]  ;;  %v1504_v31 = vld [vmem:[#allocation3 + $0x8] sm:$0xff] }
 0x203   : > { %2359 = vmatpush3.msra.mxu0 %v1503_v30  ;;  %2364 = vmatpush3.msra.mxu1 %v1504_v31  ;;  %v1505_v59 = vld [vmem:[#allocation3 + $0x10] sm:$0xff]  ;;  %v1506_v62 = vld [vmem:[#allocation3 + $0x18] sm:$0xff] }
 0x204   : > { %2368 = vmatprep.subr.mxu0 %v2821_v0  ;;  %2373 = vmatprep.subr.mxu1 %v2821_v0 }
 0x2b1   : > { %v1231_v33 = vpop.f32.mrf.mxu1 }
 0x2b2   : > { %v1463_v34 = vsel %vm774_vm2, %v1231_v33, -inf }
 0x2b3   : > { %1464 = vmax.xlane.f32.xlu0 %v1463_v34  ;;  %v2342_v35 = vpop.f32.mrf.mxu1 }
 0x2b5   : > { %v1307_v36 = vpop.f32.mrf.mxu1 }
 0x2b6   : > { %v1466_v37 = vsel %vm774_vm2, %v1307_v36, -inf }
 0x2b7   : > { %1467 = vmax.xlane.f32.xlu1 %v1466_v37  ;;  %v2347_v39 = vpop.f32.mrf.mxu1 }
 0x2b9   : > { %v1383_v40 = vpop.f32.mrf.mxu1 }
 0x2ba   : > { %v1469_v41 = vsel %vm774_vm2, %v1383_v40, -inf }
 0x2bb   : > { %1470 = vmax.xlane.f32.xlu1 %v1469_v41  ;;  %v2352_v42 = vpop.f32.mrf.mxu1  ;;  %v1957_v41 = vld [vmem:[#allocation15 + $0x8] sm:$0xff] }
 0x2bd   : > { %v1459_v43 = vpop.f32.mrf.mxu1 }
 0x2be   : > { %v1472_v44 = vsel %vm774_vm2, %v1459_v43, -inf }
 0x2bf   : > { %1473 = vmax.xlane.f32.xlu0 %v1472_v44  ;;  %v2357_v45 = vpop.f32.mrf.mxu1 }
 0x33c   : > { %v1465_v46 = vpop.xlane.xlu0 %1464 }
 0x33d   : > { %v1475_v47 = vsub.f32 %v1231_v33, %v1465_v46 }
 0x33f   : > { %v1479_v48 = vmul.f32 1.442695, %v1475_v47 }
 0x340   : > { %v1468_v49 = vpop.xlane.xlu1 %1467 }
 0x341   : > { %2514 = vpow2.f32 %v1479_v48  ;;  %v1476_v50 = vsub.f32 %v1307_v36, %v1468_v49 }
 0x343   : > { %v1481_v51 = vmul.f32 1.442695, %v1476_v50  ;;  %v1956_v50 = vld [vmem:[#allocation15] sm:$0xff] }
 0x344   : > { %v1471_v52 = vpop.xlane.xlu1 %1470 }
 0x345   : > { %2516 = vpow2.f32 %v1481_v51  ;;  %v1477_v53 = vsub.f32 %v1383_v40, %v1471_v52  ;;  %v1958_v40 = vld [vmem:[#allocation15 + $0x10] sm:$0xff] }
 0x347   : > { %v1483_v54 = vmul.f32 1.442695, %v1477_v53 }
 0x348   : > { %v1474_v55 = vpop.xlane.xlu0 %1473 }
 0x349   : > { %2518 = vpow2.f32 %v1483_v54  ;;  %v1478_v56 = vsub.f32 %v1459_v43, %v1474_v55 }
 0x34b   : > { %v1485_v57 = vmul.f32 1.442695, %v1478_v56 }
 0x34d   : > { %2520 = vpow2.f32 %v1485_v57 }
 0x34e   : > { %v2515_v58 = vpop.eup %2514 }
 0x34f   : > { %2361 = vmatmul.mubr.msk.f32.vlgmr.msra.gmra.mxu0 %vm774_vm2, %v2515_v58  ;;  %v1487_v60 = vsel %vm774_vm2, %v2515_v58, 0.0 }
 0x350   : > { %2369 = vmatpush3.msra.mxu0 %v1505_v59  ;;  %1488 = vadd.xlane.f32.xlu0 %v1487_v60 }
 0x351   : > { %2370 = vmatprep.mubr.msk.f32.mxu0 %vm2822_vm0, %v2821_v0  ;;  %2378 = vmatprep.subr.mxu0 %v2821_v0 }
 0x352   : > { %v2517_v61 = vpop.eup %2516 }
 0x353   : > { %2366 = vmatmul.mubr.msk.f32.vlgmr.msra.gmra.mxu1 %vm774_vm2, %v2517_v61  ;;  %v1490_v63 = vsel %vm774_vm2, %v2517_v61, 0.0 }
 0x354   : > { %2374 = vmatpush3.msra.mxu1 %v1506_v62  ;;  %1491 = vadd.xlane.f32.xlu1 %v1490_v63 }
 0x355   : > { %2375 = vmatprep.mubr.msk.f32.mxu1 %vm2822_vm0, %v2821_v0 }
 0x356   : > { %v2519_v1 = vpop.eup %2518 }
 0x357   : > { %2371 = vmatmul.mubr.msk.f32.vlgmr.msra.gmra.mxu0 %vm774_vm2, %v2519_v1  ;;  %v1493_v2 = vsel %vm774_vm2, %v2519_v1, 0.0 }
 0x358   : > { %1494 = vadd.xlane.f32.xlu0 %v1493_v2  ;;  %2386 = vmatprep.mubr.msk.f32.mxu0 %vm2822_vm0, %v2821_v0 }
 0x359   : > { %2379 = vmatpush3.msra.mxu0 %v1959_v5 }
 0x35a   : > { %v2521_v3 = vpop.eup %2520  ;;  %2380 = vmatprep.subr.mxu0 %v2821_v0 }
 0x35b   : > { %2376 = vmatmul.mubr.msk.f32.vlgmr.msra.gmra.mxu1 %vm774_vm2, %v2521_v3  ;;  %v1496_v4 = vsel %vm774_vm2, %v2521_v3, 0.0  ;;  %2381 = vmatpush3.msra.mxu0 %v1958_v40 }
 0x35c   : > { %1497 = vadd.xlane.f32.xlu1 %v1496_v4  ;;  %2382 = vmatprep.subr.mxu0 %v2821_v0 }
 0x35d   : > { %2383 = vmatpush3.msra.mxu0 %v1957_v41 }
 0x35e   : > { %2384 = vmatprep.subr.mxu0 %v2821_v0 }
 0x35f   : > { %2385 = vmatpush3.msra.mxu0 %v1956_v50 }
 0x3d9   : > { %v1489_v6 = vpop.xlane.xlu0 %1488 }
 0x3dd   : > { %v1492_v7 = vpop.xlane.xlu1 %1491 }
 0x3e1   : > { %v1495_v20 = vpop.xlane.xlu0 %1494 }
 0x3e2   : > { %2522 = vrcp.f32 %v1495_v20 }
 0x3e3   : > { %2524 = vrcp.f32 %v1489_v6 }
 0x3e4   : > { %2526 = vrcp.f32 %v1492_v7  ;;  %v2263_v7 = vld [vmem:[%s3311_s7] ss:$0 sm:$0xff] }
 0x3e5   : > { %v1498_v8 = vpop.xlane.xlu1 %1497 }
 0x3e6   : > { %2528 = vrcp.f32 %v1498_v8 }
 0x3ef   : > { %v2523_v13 = vpop.eup %2522 }
 0x3f0   : > { %v2525_v16 = vpop.eup %2524 }
 0x3f1   : > { %v2527_v18 = vpop.eup %2526 }
 0x3f3   : > { %v2529_v21 = vpop.eup %2528 }
 0x40f   : > { %v1576_v9 = vpop.f32.mrf.mxu0 }
 0x410   : > { %v1799_v19 = vmul.f32 %v2525_v16, %v1576_v9 }
 0x411   : > { %v2362_v10 = vpop.f32.mrf.mxu0 }
 0x413   : > { %v1649_v11 = vpop.f32.mrf.mxu1 }
 0x414   : > { %v1800_v23 = vmul.f32 %v2527_v18, %v1649_v11 }
 0x415   : > { %v2367_v12 = vpop.f32.mrf.mxu1 }
 0x417   : > { %v1722_v14 = vpop.f32.mrf.mxu0 }
 0x418   : > { %v1801_v15 = vmul.f32 %v2523_v13, %v1722_v14 }
 0x419   : > { %v2372_v17 = vpop.f32.mrf.mxu0 }
 0x41a   : > { %v1803_v24 = vcombine.low %v1799_v19, %v1801_v15  ;;  %v1804_v25 = vcombine.high %v1799_v19, %v1801_v15 }
 0x41b   : > { %v1795_v22 = vpop.f32.mrf.mxu1 }
 0x41c   : > { %v1802_v26 = vmul.f32 %v2529_v21, %v1795_v22  ;;  %v1811_v30 = vrot.slane %v1803_v24, %v3130_v32  ;;  %v1818_v31 = vrot.slane %v1804_v25, %v3130_v32 }
 0x41d   : > { %v2377_v27 = vpop.f32.mrf.mxu1 }
 0x41e   : > { %v1819_v28 = vcombine.low %v1800_v23, %v1802_v26  ;;  %v1820_v29 = vcombine.high %v1800_v23, %v1802_v26 }
 0x420   : > { %v1827_v33 = vrot.slane %v1819_v28, %v3130_v32  ;;  %v1834_v34 = vrot.slane %v1820_v29, %v3130_v32 }
 0x422   : > { %v1835_v35 = vcombine.low %v1811_v30, %v1827_v33  ;;  %v1836_v36 = vcombine.high %v1811_v30, %v1827_v33  ;;  %v1851_v37 = vcombine.low %v1818_v31, %v1834_v34  ;;  %v1852_v39 = vcombine.high %v1818_v31, %v1834_v34 }
 0x424   : > { %v1843_v42 = vrot.slane %v1835_v35, %v3132_v38  ;;  %v1850_v43 = vrot.slane %v1836_v36, %v3132_v38  ;;  %v1859_v44 = vrot.slane %v1851_v37, %v3132_v38  ;;  %v1866_v45 = vrot.slane %v1852_v39, %v3132_v38 }
 0x426   : > { %v1871_v46 = vcombine.low %v1843_v42, %v1850_v43  ;;  %v2261_v47 = vcombine.high %v1843_v42, %v1850_v43  ;;  %v1887_v48 = vcombine.low %v1859_v44, %v1866_v45  ;;  %v2262_v49 = vcombine.high %v1859_v44, %v1866_v45 }
 0x428   : > { %v1878_v51 = vrot.slane %v1871_v46, %v3130_v32  ;;  %v1886_v52 = vrot.slane %v2261_v47, %v3130_v32  ;;  %v1894_v53 = vrot.slane %v1887_v48, %v3130_v32  ;;  %v1902_v54 = vrot.slane %v2262_v49, %v3130_v32 }
 0x42a   : > { %v1904_v55 = vcombine.high %v1878_v51, %v1886_v52  ;;  %v1920_v56 = vcombine.high %v1894_v53, %v1902_v54  ;;  %v1903_v57 = vcombine.low %v1878_v51, %v1886_v52  ;;  %v1919_v58 = vcombine.low %v1894_v53, %v1902_v54 }
 0x42c   : > { %v1918_v59 = vrot.slane %v1904_v55, %v3132_v38  ;;  %v1934_v60 = vrot.slane %v1920_v56, %v3132_v38  ;;  %v1911_v0 = vrot.slane %v1903_v57, %v3132_v38  ;;  %v1927_v61 = vrot.slane %v1919_v58, %v3132_v38 }
 0x42e   : > { %v1937_v62 = vcombine.low %v1918_v59, %v1934_v60  ;;  %v1936_v63 = vcombine.high %v1911_v0, %v1927_v61  ;;  %v1935_v1 = vcombine.low %v1911_v0, %v1927_v61  ;;  %v1938_v32 = vcombine.high %v1918_v59, %v1934_v60 }
 0x430   : > { %1944 = vrot.lane.b32.xlu1 %v1937_v62, %s2828_s14  ;;  %1940 = vrot.lane.b32.xlu0 %v1936_v63, %s2829_s10 }
 0x434   : > { %1948 = vrot.lane.b32.xlu1 %v1938_v32, %s2830_s3 }
 0x4a2   : > { %v1945_v2 = vpop.permute.xlu1 %1944  ;;  %v1941_v3 = vpop.permute.xlu0 %1940 }
 0x4a3   : > { %v1951_v4 = vsel %vm774_vm2, %v1935_v1, %v1941_v3 }
 0x4a4   : > { %v1953_v5 = vsel %vm1952_vm3, %v1951_v4, %v1945_v2 }
 0x4a6   : > { %v1949_v38 = vpop.permute.xlu1 %1948 }
 0x4a7   : > { %v1955_v6 = vsel %vm1954_vm4, %v1953_v5, %v1949_v38 }
 0x4a8   : > { %2387 = vmatmul.mubr.msk.f32.vlgmr.msra.gmra.mxu0 %vm476_vm1, %v1955_v6 }
 0x568   : > { %v2036_v20 = vpop.f32.mrf.mxu0 }
 0x569   : > { %v2037_v8 = vadd.f32 %v2263_v7, %v2036_v20 }
 0x56a   : > { %v2388_v9 = vpop.f32.mrf.mxu0 }
 0x56b   : > { %2040 = vst [vmem:[%s466_s20] sm:$0xff] %v2037_v8 }
 0x56c   : > { %2731 = shalt.err (!%p2728_p4)
}
 0x56d   : > { %s2732_s9 = scalar_lea.hbm %s3262_s17, 128  ;;  %s2736_s25 = scalar_lea.hbm %s3312_s8, 256 }
 0x56e   : > { %p2733_p8 = scmp.ne.s32.totalorder %s3262_s17, %s2732_s9  ;;  %p2737_p0 = scmp.lt.s32.totalorder %s3262_s17, %s3312_s8 }
 0x56f   : > { %p2738_p13 = scmp.lt.s32.totalorder %s2736_s25, %s2732_s9 }
 0x570   : > { %p2734_p6 = pnand %p2733_p8, %p3360_p12 }
 0x571   : > { %p2739_p9 = por %p2738_p13, %p2737_p0 }
 0x572   : > { %p2735_p3 = pneg %p2734_p6 }
 0x574   : > { %p2740_p11 = pnand %p2739_p9, %p2735_p3 }
 0x576   : > { %2743 = shalt.err (!%p2740_p11)
}
 0x577   : > { %2411 = dma.vmem_to_hbm [thread:$0]  (%p3360_p12), %s2057_s13, 128, %s3262_s17, %s2042_s19  }
 0x578 PF: > { %s3361_s1 = sld [smem:[#allocation22_spill]] }
 0x579   : > { %s3362_s14 = sld [smem:[#allocation27_spill]] }
 0x57a   : > { %s3363_s10 = sld [smem:[#allocation24_spill]] }
 0x57e   : > { %s2068_s3 = sand.u32 1, %s3361_s1  }
 0x57f   : > { %p3364_p2 = scmp.ne.s32.totalorder %s3362_s14, 0  ;;  %s2069_s23 = scalar_lea.sflag [#allocation6], %s2068_s3 }
 0x580   : > { %p3365_p5 = scmp.ge.s32.totalorder %s3363_s10, 2 }
 0x582   : > { %p2437_p10 = pnand %p3365_p5, %p3364_p2 }
 0x584   : > { %p2438_p1 = pneg %p2437_p10 }
 0x586   : > { %2785 = dma.done.wait (%p2438_p1), %s2069_s23, 128  }
 0x587   : > { %2787 = vsyncadd (%p2438_p1), %s2069_s23, 4294967168  ;;  %s29_s10 = sadd.s32 1, %s3363_s10   ;;  %s3366_s21 = sld [smem:[#allocation26_spill]] }
 0x588   : > { %p26_p7 = scmp.ge.s32.totalorder %s29_s10, 4   ;;  %s3367_s30 = sld [smem:[#allocation23_spill]] }
 0x589   : > { %s3368_s9 = sld [smem:[#allocation25_spill]]  ;;  %s3369_s27 = smov %s2794_s28 }
 0x58a   : > { %s3370_s28 = smov %s2798_s29  ;;  %28 = sbr.rel (!%p26_p7) target bundleno = 15 (0xf), region = 141 }
 0x58d   : > { %s3371_s29 = smov %s3366_s21 }
 0x58f   :  { %2074 = vsyncpa [#allocation5], 1 }
 0x590   :  { %2076 = vsyncpa [#allocation5 + $0x1], 1 }
 0x591   :  { %2077 = vsyncpa [#allocation8], 1 }
 0x592   :  { %2079 = vsyncpa [#allocation8 + $0x1], 1 }
 0x593   :  { %2080 = vsyncpa [#allocation11], 1 }
 0x594   :  { %2081 = vsyncpa [#allocation14], 1 }
 0x595   :  { %2082 = vsyncpa [#allocation6], 1 }
 0x596   :  { %2084 = vsyncpa [#allocation6 + $0x1], 1 }

</bundles_post_ra>
